<compile_context>
chip_gen: v5e
topology: v5e:2x2
jax: 0.10.0
libtpu: 0.0.40
codegen_flags: <defaults>
</compile_context>

<pallas_src>
import functools

import jax
import jax.numpy as jnp
from jax.experimental import pallas as pl
from jax.experimental.pallas import tpu as pltpu

NEG_SLOPE = 0.01   # F.leaky_relu / nn.LeakyReLU default
BN_EPS = 1e-5


def _lrelu(x):
    return jnp.where(x >= 0, x, NEG_SLOPE * x)


# ----------------------- in-kernel building blocks -------------------------

def _conv1d_lrelu(h, wt_ref, b_ref):
    """'Same' Conv1d + (BN-folded) bias + LeakyReLU in channels-last layout.

    h: (L, Cin) value; wt_ref: (K, Cin, Cout) taps-major weights (BN folded);
    b_ref: (1, Cout).  im2col happens in-register: zero-pad along L (sublanes)
    and accumulate K shifted (L, Cin) @ (Cin, Cout) matmuls.
    """
    L, Cin = h.shape
    K = wt_ref.shape[0]
    pad = (K - 1) // 2
    zp = jnp.zeros((pad, Cin), jnp.float32)
    hp = jnp.concatenate([zp, h, zp], axis=0)            # (L + 2*pad, Cin)
    acc = jnp.dot(hp[0:L, :], wt_ref[0], preferred_element_type=jnp.float32)
    for t in range(1, K):
        acc = acc + jnp.dot(hp[t:t + L, :], wt_ref[t],
                            preferred_element_type=jnp.float32)
    return _lrelu(acc + b_ref[...])


def _channel_attention(h, w1_ref, b1_ref, w2_ref, b2_ref):
    """h: (L, C).  sigmoid(MLP(avg_L) + MLP(max_L)) channel gate.
    avg/max are batched into one (2, C) matrix so the shared MLP runs once."""
    avg = jnp.mean(h, axis=0, keepdims=True)             # (1, C)
    mx = jnp.max(h, axis=0, keepdims=True)               # (1, C)
    v = jnp.concatenate([avg, mx], axis=0)               # (2, C)
    z = _lrelu(jnp.dot(v, w1_ref[...], preferred_element_type=jnp.float32)
               + b1_ref[...])
    z = jnp.dot(z, w2_ref[...], preferred_element_type=jnp.float32) + b2_ref[...]
    attn = jax.nn.sigmoid(jnp.sum(z, axis=0, keepdims=True))   # (1, C)
    return h * attn


def _spatial_attention_pool(h, m_ref, b_ref, pool_ref):
    """h: (L, C).  Spatial attention: conv1d over [mean_C; max_C] expressed as
    two precomputed (L, L) band matmuls, sigmoid gate, then AvgPool1d(2) as a
    precomputed (L/2, L) matmul.  Output: (L/2, C), still lane-dense in C."""
    avg = jnp.mean(h, axis=1, keepdims=True)             # (L, 1)
    mx = jnp.max(h, axis=1, keepdims=True)               # (L, 1)
    pre = (jnp.dot(m_ref[0], avg, preferred_element_type=jnp.float32)
           + jnp.dot(m_ref[1], mx, preferred_element_type=jnp.float32)
           + b_ref[...])                                 # (L, 1)
    y = h * jax.nn.sigmoid(pre)                          # (L, C)
    return jnp.dot(pool_ref[...], y, preferred_element_type=jnp.float32)


# ------------------------------ fused kernel -------------------------------

def _fused_forward_kernel(
        x_ref,
        # stage 1
        w1_ref, b1_ref, ca1w1_ref, ca1b1_ref, ca1w2_ref, ca1b2_ref,
        sa1m_ref, sa1b_ref, pool1_ref,
        # stage 2
        w2_ref, b2_ref, ca2w1_ref, ca2b1_ref, ca2w2_ref, ca2b2_ref,
        sa2m_ref, sa2b_ref, pool2_ref,
        # stage 3
        w3_ref, b3_ref, pool3_ref,
        # head
        fc1w_ref, fc1b_ref, fc2w_ref, fc2b_ref, fc3w_ref, fc3b_ref,
        # output
        o_ref):
    h = x_ref[0]                                   # (L, Cin), channels on lanes

    # stage 1: conv(+folded BN)+LReLU -> channel attn -> spatial attn -> pool
    h = _conv1d_lrelu(h, w1_ref, b1_ref)
    h = _channel_attention(h, ca1w1_ref, ca1b1_ref, ca1w2_ref, ca1b2_ref)
    h = _spatial_attention_pool(h, sa1m_ref, sa1b_ref, pool1_ref)

    # stage 2
    h = _conv1d_lrelu(h, w2_ref, b2_ref)
    h = _channel_attention(h, ca2w1_ref, ca2b1_ref, ca2w2_ref, ca2b2_ref)
    h = _spatial_attention_pool(h, sa2m_ref, sa2b_ref, pool2_ref)

    # stage 3: conv(+folded BN)+LReLU -> pool
    h = _conv1d_lrelu(h, w3_ref, b3_ref)
    h = jnp.dot(pool3_ref[...], h, preferred_element_type=jnp.float32)  # (L3, C3)

    # head: fc1 consumes the (L3, C3) feature directly from vregs; PyTorch's
    # NCL flatten order (c * L3 + l) is handled by the fc1 weight-block permute.
    # TODO(synk): drop1/drop2 are eval-mode identity.
    f = fc1b_ref[...]                              # (1, 128)
    for l in range(h.shape[0]):
        f = f + jnp.dot(h[l:l + 1, :], fc1w_ref[l],
                        preferred_element_type=jnp.float32)
    f = _lrelu(f)
    g = _lrelu(jnp.dot(f, fc2w_ref[...], preferred_element_type=jnp.float32)
               + fc2b_ref[...])
    out = (jnp.dot(g, fc3w_ref[...], preferred_element_type=jnp.float32)
           + fc3b_ref[...])                        # (1, 1)
    o_ref[0] = out


# ------------------------------ call wrapper --------------------------------

def _zero_index(ndim, b):
    return (0,) * ndim


_KP_ORDER = (
    "w1", "b1", "ca1_w1", "ca1_b1", "ca1_w2", "ca1_b2", "sa1_m", "sa1_b", "pool1",
    "w2", "b2", "ca2_w1", "ca2_b1", "ca2_w2", "ca2_b2", "sa2_m", "sa2_b", "pool2",
    "w3", "b3", "pool3",
    "fc1_w", "fc1_b", "fc2_w", "fc2_b", "fc3_w", "fc3_b",
)


@jax.jit
def eeg_angle_forward(x_ncl, kp):
    """x_ncl: (B, Cin, L) exactly like the PyTorch module.  Returns (B, 1)."""
    B, Cin, L = x_ncl.shape
    x = jnp.transpose(x_ncl, (0, 2, 1)).astype(jnp.float32)   # (B, L, Cin)

    operands = [x] + [kp[k] for k in _KP_ORDER]
    in_specs = [pl.BlockSpec((1, L, Cin), lambda b: (b, 0, 0))]
    in_specs += [pl.BlockSpec(a.shape, functools.partial(_zero_index, a.ndim))
                 for a in operands[1:]]

    out = pl.pallas_call(
        _fused_forward_kernel,
        out_shape=jax.ShapeDtypeStruct((B, 1, 1), jnp.float32),
        grid=(B,),
        in_specs=in_specs,
        out_specs=pl.BlockSpec((1, 1, 1), lambda b: (b, 0, 0)),
        compiler_params=pltpu.CompilerParams(
            dimension_semantics=("parallel",)),
    )(*operands)
    return out.reshape(B, 1)


# ------------------------------ parameters ----------------------------------

def init_params(key, input_channels, sample_length, num_filters):
    """Raw model parameters (Linear weights stored as (in, out))."""
    ks = iter(jax.random.split(key, 64))
    nrm = lambda shape, s=0.1: (s * jax.random.normal(next(ks), shape)
                                ).astype(jnp.float32)
    pos = lambda shape: (0.5 + jax.random.uniform(next(ks), shape)
                         ).astype(jnp.float32)

    nf, nf2, nf4 = num_filters, num_filters * 2, num_filters * 4
    r = 16
    L3 = sample_length // 8
    feat = nf4 * L3

    return {
        # stage 1
        "conv1_w": nrm((nf, input_channels, 7)), "conv1_b": nrm((nf,)),
        "bn1_g": pos((nf,)), "bn1_b": nrm((nf,)),
        "bn1_mu": nrm((nf,)), "bn1_var": pos((nf,)),
        "ca1_w1": nrm((nf, nf // r)), "ca1_b1": nrm((nf // r,)),
        "ca1_w2": nrm((nf // r, nf)), "ca1_b2": nrm((nf,)),
        "sa1_w": nrm((1, 2, 7)), "sa1_b": nrm((1,)),
        # stage 2
        "conv2_w": nrm((nf2, nf, 5)), "conv2_b": nrm((nf2,)),
        "bn2_g": pos((nf2,)), "bn2_b": nrm((nf2,)),
        "bn2_mu": nrm((nf2,)), "bn2_var": pos((nf2,)),
        "ca2_w1": nrm((nf2, nf2 // r)), "ca2_b1": nrm((nf2 // r,)),
        "ca2_w2": nrm((nf2 // r, nf2)), "ca2_b2": nrm((nf2,)),
        "sa2_w": nrm((1, 2, 5)), "sa2_b": nrm((1,)),
        # stage 3
        "conv3_w": nrm((nf4, nf2, 3)), "conv3_b": nrm((nf4,)),
        "bn3_g": pos((nf4,)), "bn3_b": nrm((nf4,)),
        "bn3_mu": nrm((nf4,)), "bn3_var": pos((nf4,)),
        # head
        "fc1_w": nrm((feat, 128)), "fc1_b": nrm((128,)),
        "fc2_w": nrm((128, 64)), "fc2_b": nrm((64,)),
        "fc3_w": nrm((64, 1)), "fc3_b": nrm((1,)),
    }


def _band_matrix(taps, length, pad):
    """(L, L) matrix M with M[l_out, l_in] = taps[l_in - l_out + pad]."""
    K = taps.shape[0]
    lo = jnp.arange(length)[:, None]
    li = jnp.arange(length)[None, :]
    t = li - lo + pad
    valid = (t >= 0) & (t < K)
    return jnp.where(valid, taps[jnp.clip(t, 0, K - 1)], 0.0).astype(jnp.float32)


def _pool_matrix(length):
    """(L/2, L) matrix implementing AvgPool1d(kernel_size=2)."""
    j = jnp.arange(length // 2)[:, None]
    i = jnp.arange(length)[None, :]
    return jnp.where((i // 2) == j, 0.5, 0.0).astype(jnp.float32)


def prepare_params(p, sample_length):
    """One-time prep: fold eval BatchNorm into the conv weights, reorder to the
    kernel's channels-last layout, precompute band / pooling matrices."""
    L1 = sample_length      # stage-1 conv / spatial-attn length
    L2 = L1 // 2            # stage-2
    L3p = L2 // 2           # stage-3 conv length (pre-pool)
    L3 = L3p // 2           # flattened length after pool3

    def fold_conv(W, b, g, be, mu, var):
        scale = g * jax.lax.rsqrt(var + BN_EPS)          # (Cout,)
        Wf = W * scale[:, None, None]                    # (Cout, Cin, K)
        bf = (b - mu) * scale + be
        return (jnp.transpose(Wf, (2, 1, 0)).astype(jnp.float32),  # (K, Cin, Cout)
                bf.reshape(1, -1).astype(jnp.float32))

    def sa_bands(w, length):
        K = w.shape[-1]
        pad = (K - 1) // 2
        return jnp.stack([_band_matrix(w[0, 0], length, pad),
                          _band_matrix(w[0, 1], length, pad)], axis=0)

    w1, b1 = fold_conv(p["conv1_w"], p["conv1_b"], p["bn1_g"], p["bn1_b"],
                       p["bn1_mu"], p["bn1_var"])
    w2, b2 = fold_conv(p["conv2_w"], p["conv2_b"], p["bn2_g"], p["bn2_b"],
                       p["bn2_mu"], p["bn2_var"])
    w3, b3 = fold_conv(p["conv3_w"], p["conv3_b"], p["bn3_g"], p["bn3_b"],
                       p["bn3_mu"], p["bn3_var"])

    C3 = p["conv3_w"].shape[0]
    # PyTorch flattens NCL as feature = c * L3 + l; the kernel holds (L3, C3),
    # so permute fc1 rows into per-position (L3, C3, 128) weight blocks.
    fc1_blocks = p["fc1_w"].reshape(C3, L3, -1).transpose(1, 0, 2)

    kp = {
        "w1": w1, "b1": b1,
        "ca1_w1": p["ca1_w1"], "ca1_b1": p["ca1_b1"].reshape(1, -1),
        "ca1_w2": p["ca1_w2"], "ca1_b2": p["ca1_b2"].reshape(1, -1),
        "sa1_m": sa_bands(p["sa1_w"], L1), "sa1_b": p["sa1_b"].reshape(1, 1),
        "pool1": _pool_matrix(L1),
        "w2": w2, "b2": b2,
        "ca2_w1": p["ca2_w1"], "ca2_b1": p["ca2_b1"].reshape(1, -1),
        "ca2_w2": p["ca2_w2"], "ca2_b2": p["ca2_b2"].reshape(1, -1),
        "sa2_m": sa_bands(p["sa2_w"], L2), "sa2_b": p["sa2_b"].reshape(1, 1),
        "pool2": _pool_matrix(L2),
        "w3": w3, "b3": b3,
        "pool3": _pool_matrix(L3p),
        "fc1_w": fc1_blocks, "fc1_b": p["fc1_b"].reshape(1, -1),
        "fc2_w": p["fc2_w"], "fc2_b": p["fc2_b"].reshape(1, -1),
        "fc3_w": p["fc3_w"], "fc3_b": p["fc3_b"].reshape(1, -1),
    }
    return jax.tree_util.tree_map(lambda a: jnp.asarray(a, jnp.float32), kp)


# --------------------------------- main --------------------------------------

if __name__ == "__main__":
    INPUT_CHANNELS = 8
    SAMPLE_LENGTH = 32
    NUM_FILTERS = 32   # keeps reduction_ratio=16 valid (32 // 16 = 2)
    BATCH = 2

    key = jax.random.PRNGKey(0)
    kx, kparam = jax.random.split(key)
    x = jax.random.normal(kx, (BATCH, INPUT_CHANNELS, SAMPLE_LENGTH),
                          dtype=jnp.float32)
    params = init_params(kparam, INPUT_CHANNELS, SAMPLE_LENGTH, NUM_FILTERS)
    kernel_params = prepare_params(params, SAMPLE_LENGTH)   # one-time prep

    out = eeg_angle_forward(x, kernel_params)
    out = jax.block_until_ready(out)
    assert out.shape == (BATCH, 1), out.shape
    print("KERNEL_OK")
</pallas_src>

<mosaic_0001>
module attributes {stable_mosaic.version = 11 : i64} {
  func.func @_fused_forward_kernel(%arg0: i32, %arg1: memref<1x32x8xf32, #tpu.memory_space<vmem>>, %arg2: memref<7x8x32xf32, #tpu.memory_space<vmem>>, %arg3: memref<1x32xf32, #tpu.memory_space<vmem>>, %arg4: memref<32x2xf32, #tpu.memory_space<vmem>>, %arg5: memref<1x2xf32, #tpu.memory_space<vmem>>, %arg6: memref<2x32xf32, #tpu.memory_space<vmem>>, %arg7: memref<1x32xf32, #tpu.memory_space<vmem>>, %arg8: memref<2x32x32xf32, #tpu.memory_space<vmem>>, %arg9: memref<1x1xf32, #tpu.memory_space<vmem>>, %arg10: memref<16x32xf32, #tpu.memory_space<vmem>>, %arg11: memref<5x32x64xf32, #tpu.memory_space<vmem>>, %arg12: memref<1x64xf32, #tpu.memory_space<vmem>>, %arg13: memref<64x4xf32, #tpu.memory_space<vmem>>, %arg14: memref<1x4xf32, #tpu.memory_space<vmem>>, %arg15: memref<4x64xf32, #tpu.memory_space<vmem>>, %arg16: memref<1x64xf32, #tpu.memory_space<vmem>>, %arg17: memref<2x16x16xf32, #tpu.memory_space<vmem>>, %arg18: memref<1x1xf32, #tpu.memory_space<vmem>>, %arg19: memref<8x16xf32, #tpu.memory_space<vmem>>, %arg20: memref<3x64x128xf32, #tpu.memory_space<vmem>>, %arg21: memref<1x128xf32, #tpu.memory_space<vmem>>, %arg22: memref<4x8xf32, #tpu.memory_space<vmem>>, %arg23: memref<4x128x128xf32, #tpu.memory_space<vmem>>, %arg24: memref<1x128xf32, #tpu.memory_space<vmem>>, %arg25: memref<128x64xf32, #tpu.memory_space<vmem>>, %arg26: memref<1x64xf32, #tpu.memory_space<vmem>>, %arg27: memref<64x1xf32, #tpu.memory_space<vmem>>, %arg28: memref<1x1xf32, #tpu.memory_space<vmem>>, %arg29: memref<1x1x1xf32, #tpu.memory_space<vmem>>) attributes {dimension_semantics = [#tpu.dimension_semantics<parallel>], iteration_bounds = array<i64: 2>, scalar_prefetch = 0 : i64, scratch_operands = 0 : i64, tpu.core_type = #tpu.core_type<tc>, window_params = [{transform_indices = @transform_0, window_bounds = array<i64: 1, 32, 8>}, {pipeline_mode = #tpu.pipeline_mode<synchronous>, transform_indices = @transform_1, window_bounds = array<i64: 7, 8, 32>}, {pipeline_mode = #tpu.pipeline_mode<synchronous>, transform_indices = @transform_2, window_bounds = array<i64: 1, 32>}, {pipeline_mode = #tpu.pipeline_mode<synchronous>, transform_indices = @transform_3, window_bounds = array<i64: 32, 2>}, {pipeline_mode = #tpu.pipeline_mode<synchronous>, transform_indices = @transform_4, window_bounds = array<i64: 1, 2>}, {pipeline_mode = #tpu.pipeline_mode<synchronous>, transform_indices = @transform_5, window_bounds = array<i64: 2, 32>}, {pipeline_mode = #tpu.pipeline_mode<synchronous>, transform_indices = @transform_6, window_bounds = array<i64: 1, 32>}, {pipeline_mode = #tpu.pipeline_mode<synchronous>, transform_indices = @transform_7, window_bounds = array<i64: 2, 32, 32>}, {pipeline_mode = #tpu.pipeline_mode<synchronous>, transform_indices = @transform_8, window_bounds = array<i64: 1, 1>}, {pipeline_mode = #tpu.pipeline_mode<synchronous>, transform_indices = @transform_9, window_bounds = array<i64: 16, 32>}, {pipeline_mode = #tpu.pipeline_mode<synchronous>, transform_indices = @transform_10, window_bounds = array<i64: 5, 32, 64>}, {pipeline_mode = #tpu.pipeline_mode<synchronous>, transform_indices = @transform_11, window_bounds = array<i64: 1, 64>}, {pipeline_mode = #tpu.pipeline_mode<synchronous>, transform_indices = @transform_12, window_bounds = array<i64: 64, 4>}, {pipeline_mode = #tpu.pipeline_mode<synchronous>, transform_indices = @transform_13, window_bounds = array<i64: 1, 4>}, {pipeline_mode = #tpu.pipeline_mode<synchronous>, transform_indices = @transform_14, window_bounds = array<i64: 4, 64>}, {pipeline_mode = #tpu.pipeline_mode<synchronous>, transform_indices = @transform_15, window_bounds = array<i64: 1, 64>}, {pipeline_mode = #tpu.pipeline_mode<synchronous>, transform_indices = @transform_16, window_bounds = array<i64: 2, 16, 16>}, {pipeline_mode = #tpu.pipeline_mode<synchronous>, transform_indices = @transform_17, window_bounds = array<i64: 1, 1>}, {pipeline_mode = #tpu.pipeline_mode<synchronous>, transform_indices = @transform_18, window_bounds = array<i64: 8, 16>}, {pipeline_mode = #tpu.pipeline_mode<synchronous>, transform_indices = @transform_19, window_bounds = array<i64: 3, 64, 128>}, {pipeline_mode = #tpu.pipeline_mode<synchronous>, transform_indices = @transform_20, window_bounds = array<i64: 1, 128>}, {pipeline_mode = #tpu.pipeline_mode<synchronous>, transform_indices = @transform_21, window_bounds = array<i64: 4, 8>}, {pipeline_mode = #tpu.pipeline_mode<synchronous>, transform_indices = @transform_22, window_bounds = array<i64: 4, 128, 128>}, {pipeline_mode = #tpu.pipeline_mode<synchronous>, transform_indices = @transform_23, window_bounds = array<i64: 1, 128>}, {pipeline_mode = #tpu.pipeline_mode<synchronous>, transform_indices = @transform_24, window_bounds = array<i64: 128, 64>}, {pipeline_mode = #tpu.pipeline_mode<synchronous>, transform_indices = @transform_25, window_bounds = array<i64: 1, 64>}, {pipeline_mode = #tpu.pipeline_mode<synchronous>, transform_indices = @transform_26, window_bounds = array<i64: 64, 1>}, {pipeline_mode = #tpu.pipeline_mode<synchronous>, transform_indices = @transform_27, window_bounds = array<i64: 1, 1>}, {transform_indices = @transform_28, window_bounds = array<i64: 1, 1, 1>}]} {
    %c0 = arith.constant 0 : index
    %c0_0 = arith.constant 0 : index
    %c0_1 = arith.constant 0 : index
    %0 = vector.load %arg1[%c0, %c0_0, %c0_1] : memref<1x32x8xf32, #tpu.memory_space<vmem>>, vector<1x32x8xf32>
    %1 = vector.shape_cast %0 : vector<1x32x8xf32> to vector<32x8xf32>
    %cst = arith.constant 0.000000e+00 : f32
    %2 = vector.broadcast %cst : f32 to vector<3x8xf32>
    %3 = tpu.concatenate %2, %1, %2 in 0 : vector<3x8xf32>, vector<32x8xf32>, vector<3x8xf32> -> vector<38x8xf32>
    %4 = vector.extract_strided_slice %3 {offsets = [0, 0], sizes = [32, 8], strides = [1, 1]} : vector<38x8xf32> to vector<32x8xf32>
    %c0_2 = arith.constant 0 : index
    %c0_3 = arith.constant 0 : index
    %c0_4 = arith.constant 0 : index
    %5 = vector.load %arg2[%c0_2, %c0_3, %c0_4] : memref<7x8x32xf32, #tpu.memory_space<vmem>>, vector<1x8x32xf32>
    %6 = vector.shape_cast %5 : vector<1x8x32xf32> to vector<8x32xf32>
    %cst_5 = arith.constant dense<0.000000e+00> : vector<32x32xf32>
    %7 = tpu.matmul %4, %6, %cst_5 {dimension_numbers = #tpu.dot_dimension_numbers<[1], [0], [0], [1], [0, 0, 1, 1], [], []>} : vector<32x8xf32>, vector<8x32xf32>, vector<32x32xf32> -> vector<32x32xf32>
    %8 = vector.extract_strided_slice %3 {offsets = [1, 0], sizes = [32, 8], strides = [1, 1]} : vector<38x8xf32> to vector<32x8xf32>
    %c1 = arith.constant 1 : index
    %c0_6 = arith.constant 0 : index
    %c0_7 = arith.constant 0 : index
    %9 = vector.load %arg2[%c1, %c0_6, %c0_7] : memref<7x8x32xf32, #tpu.memory_space<vmem>>, vector<1x8x32xf32>
    %10 = vector.shape_cast %9 : vector<1x8x32xf32> to vector<8x32xf32>
    %cst_8 = arith.constant dense<0.000000e+00> : vector<32x32xf32>
    %11 = tpu.matmul %8, %10, %cst_8 {dimension_numbers = #tpu.dot_dimension_numbers<[1], [0], [0], [1], [0, 0, 1, 1], [], []>} : vector<32x8xf32>, vector<8x32xf32>, vector<32x32xf32> -> vector<32x32xf32>
    %12 = arith.addf %7, %11 : vector<32x32xf32>
    %13 = vector.extract_strided_slice %3 {offsets = [2, 0], sizes = [32, 8], strides = [1, 1]} : vector<38x8xf32> to vector<32x8xf32>
    %c2 = arith.constant 2 : index
    %c0_9 = arith.constant 0 : index
    %c0_10 = arith.constant 0 : index
    %14 = vector.load %arg2[%c2, %c0_9, %c0_10] : memref<7x8x32xf32, #tpu.memory_space<vmem>>, vector<1x8x32xf32>
    %15 = vector.shape_cast %14 : vector<1x8x32xf32> to vector<8x32xf32>
    %cst_11 = arith.constant dense<0.000000e+00> : vector<32x32xf32>
    %16 = tpu.matmul %13, %15, %cst_11 {dimension_numbers = #tpu.dot_dimension_numbers<[1], [0], [0], [1], [0, 0, 1, 1], [], []>} : vector<32x8xf32>, vector<8x32xf32>, vector<32x32xf32> -> vector<32x32xf32>
    %17 = arith.addf %12, %16 : vector<32x32xf32>
    %18 = vector.extract_strided_slice %3 {offsets = [3, 0], sizes = [32, 8], strides = [1, 1]} : vector<38x8xf32> to vector<32x8xf32>
    %c3 = arith.constant 3 : index
    %c0_12 = arith.constant 0 : index
    %c0_13 = arith.constant 0 : index
    %19 = vector.load %arg2[%c3, %c0_12, %c0_13] : memref<7x8x32xf32, #tpu.memory_space<vmem>>, vector<1x8x32xf32>
    %20 = vector.shape_cast %19 : vector<1x8x32xf32> to vector<8x32xf32>
    %cst_14 = arith.constant dense<0.000000e+00> : vector<32x32xf32>
    %21 = tpu.matmul %18, %20, %cst_14 {dimension_numbers = #tpu.dot_dimension_numbers<[1], [0], [0], [1], [0, 0, 1, 1], [], []>} : vector<32x8xf32>, vector<8x32xf32>, vector<32x32xf32> -> vector<32x32xf32>
    %22 = arith.addf %17, %21 : vector<32x32xf32>
    %23 = vector.extract_strided_slice %3 {offsets = [4, 0], sizes = [32, 8], strides = [1, 1]} : vector<38x8xf32> to vector<32x8xf32>
    %c4 = arith.constant 4 : index
    %c0_15 = arith.constant 0 : index
    %c0_16 = arith.constant 0 : index
    %24 = vector.load %arg2[%c4, %c0_15, %c0_16] : memref<7x8x32xf32, #tpu.memory_space<vmem>>, vector<1x8x32xf32>
    %25 = vector.shape_cast %24 : vector<1x8x32xf32> to vector<8x32xf32>
    %cst_17 = arith.constant dense<0.000000e+00> : vector<32x32xf32>
    %26 = tpu.matmul %23, %25, %cst_17 {dimension_numbers = #tpu.dot_dimension_numbers<[1], [0], [0], [1], [0, 0, 1, 1], [], []>} : vector<32x8xf32>, vector<8x32xf32>, vector<32x32xf32> -> vector<32x32xf32>
    %27 = arith.addf %22, %26 : vector<32x32xf32>
    %28 = vector.extract_strided_slice %3 {offsets = [5, 0], sizes = [32, 8], strides = [1, 1]} : vector<38x8xf32> to vector<32x8xf32>
    %c5 = arith.constant 5 : index
    %c0_18 = arith.constant 0 : index
    %c0_19 = arith.constant 0 : index
    %29 = vector.load %arg2[%c5, %c0_18, %c0_19] : memref<7x8x32xf32, #tpu.memory_space<vmem>>, vector<1x8x32xf32>
    %30 = vector.shape_cast %29 : vector<1x8x32xf32> to vector<8x32xf32>
    %cst_20 = arith.constant dense<0.000000e+00> : vector<32x32xf32>
    %31 = tpu.matmul %28, %30, %cst_20 {dimension_numbers = #tpu.dot_dimension_numbers<[1], [0], [0], [1], [0, 0, 1, 1], [], []>} : vector<32x8xf32>, vector<8x32xf32>, vector<32x32xf32> -> vector<32x32xf32>
    %32 = arith.addf %27, %31 : vector<32x32xf32>
    %33 = vector.extract_strided_slice %3 {offsets = [6, 0], sizes = [32, 8], strides = [1, 1]} : vector<38x8xf32> to vector<32x8xf32>
    %c6 = arith.constant 6 : index
    %c0_21 = arith.constant 0 : index
    %c0_22 = arith.constant 0 : index
    %34 = vector.load %arg2[%c6, %c0_21, %c0_22] : memref<7x8x32xf32, #tpu.memory_space<vmem>>, vector<1x8x32xf32>
    %35 = vector.shape_cast %34 : vector<1x8x32xf32> to vector<8x32xf32>
    %cst_23 = arith.constant dense<0.000000e+00> : vector<32x32xf32>
    %36 = tpu.matmul %33, %35, %cst_23 {dimension_numbers = #tpu.dot_dimension_numbers<[1], [0], [0], [1], [0, 0, 1, 1], [], []>} : vector<32x8xf32>, vector<8x32xf32>, vector<32x32xf32> -> vector<32x32xf32>
    %37 = arith.addf %32, %36 : vector<32x32xf32>
    %c0_24 = arith.constant 0 : index
    %c0_25 = arith.constant 0 : index
    %38 = vector.load %arg3[%c0_24, %c0_25] : memref<1x32xf32, #tpu.memory_space<vmem>>, vector<1x32xf32>
    %39 = vector.broadcast %38 : vector<1x32xf32> to vector<32x32xf32>
    %40 = arith.addf %37, %39 : vector<32x32xf32>
    %cst_26 = arith.constant 0.000000e+00 : f32
    %41 = vector.broadcast %cst_26 : f32 to vector<32x32xf32>
    %42 = arith.cmpf oge, %40, %41 : vector<32x32xf32>
    %cst_27 = arith.constant 0.00999999977 : f32
    %43 = vector.broadcast %cst_27 : f32 to vector<32x32xf32>
    %44 = arith.mulf %43, %40 : vector<32x32xf32>
    %45 = arith.select %42, %40, %44 : vector<32x32xi1>, vector<32x32xf32>
    %cst_28 = arith.constant dense<0.000000e+00> : vector<32xf32>
    %46 = vector.multi_reduction <add>, %45, %cst_28 [0] : vector<32x32xf32> to vector<32xf32>
    %47 = vector.shape_cast %46 : vector<32xf32> to vector<1x32xf32>
    %cst_29 = arith.constant 3.200000e+01 : f32
    %48 = vector.broadcast %cst_29 : f32 to vector<1x32xf32>
    %49 = arith.divf %47, %48 : vector<1x32xf32>
    %cst_30 = arith.constant dense<0xFF800000> : vector<32xf32>
    %50 = vector.multi_reduction <maximumf>, %45, %cst_30 [0] : vector<32x32xf32> to vector<32xf32>
    %51 = vector.shape_cast %50 : vector<32xf32> to vector<1x32xf32>
    %52 = tpu.concatenate %49, %51 in 0 : vector<1x32xf32>, vector<1x32xf32> -> vector<2x32xf32>
    %c0_31 = arith.constant 0 : index
    %c0_32 = arith.constant 0 : index
    %53 = vector.load %arg4[%c0_31, %c0_32] : memref<32x2xf32, #tpu.memory_space<vmem>>, vector<32x2xf32>
    %cst_33 = arith.constant dense<0.000000e+00> : vector<2x2xf32>
    %54 = tpu.matmul %52, %53, %cst_33 {dimension_numbers = #tpu.dot_dimension_numbers<[1], [0], [0], [1], [0, 0, 1, 1], [], []>} : vector<2x32xf32>, vector<32x2xf32>, vector<2x2xf32> -> vector<2x2xf32>
    %c0_34 = arith.constant 0 : index
    %c0_35 = arith.constant 0 : index
    %55 = vector.load %arg5[%c0_34, %c0_35] : memref<1x2xf32, #tpu.memory_space<vmem>>, vector<1x2xf32>
    %56 = vector.broadcast %55 : vector<1x2xf32> to vector<2x2xf32>
    %57 = arith.addf %54, %56 : vector<2x2xf32>
    %cst_36 = arith.constant 0.000000e+00 : f32
    %58 = vector.broadcast %cst_36 : f32 to vector<2x2xf32>
    %59 = arith.cmpf oge, %57, %58 : vector<2x2xf32>
    %cst_37 = arith.constant 0.00999999977 : f32
    %60 = vector.broadcast %cst_37 : f32 to vector<2x2xf32>
    %61 = arith.mulf %60, %57 : vector<2x2xf32>
    %62 = arith.select %59, %57, %61 : vector<2x2xi1>, vector<2x2xf32>
    %c0_38 = arith.constant 0 : index
    %c0_39 = arith.constant 0 : index
    %63 = vector.load %arg6[%c0_38, %c0_39] : memref<2x32xf32, #tpu.memory_space<vmem>>, vector<2x32xf32>
    %cst_40 = arith.constant dense<0.000000e+00> : vector<2x32xf32>
    %64 = tpu.matmul %62, %63, %cst_40 {dimension_numbers = #tpu.dot_dimension_numbers<[1], [0], [0], [1], [0, 0, 1, 1], [], []>} : vector<2x2xf32>, vector<2x32xf32>, vector<2x32xf32> -> vector<2x32xf32>
    %c0_41 = arith.constant 0 : index
    %c0_42 = arith.constant 0 : index
    %65 = vector.load %arg7[%c0_41, %c0_42] : memref<1x32xf32, #tpu.memory_space<vmem>>, vector<1x32xf32>
    %66 = vector.broadcast %65 : vector<1x32xf32> to vector<2x32xf32>
    %67 = arith.addf %64, %66 : vector<2x32xf32>
    %cst_43 = arith.constant dense<0.000000e+00> : vector<32xf32>
    %68 = vector.multi_reduction <add>, %67, %cst_43 [0] : vector<2x32xf32> to vector<32xf32>
    %69 = vector.shape_cast %68 : vector<32xf32> to vector<1x32xf32>
    %70 = arith.negf %69 : vector<1x32xf32>
    %71 = math.exp %70 : vector<1x32xf32>
    %cst_44 = arith.constant 1.000000e+00 : f32
    %72 = vector.broadcast %cst_44 : f32 to vector<1x32xf32>
    %73 = arith.addf %72, %71 : vector<1x32xf32>
    %74 = arith.divf %72, %73 : vector<1x32xf32>
    %75 = vector.broadcast %74 : vector<1x32xf32> to vector<32x32xf32>
    %76 = arith.mulf %45, %75 : vector<32x32xf32>
    %cst_45 = arith.constant dense<0.000000e+00> : vector<32xf32>
    %77 = vector.multi_reduction <add>, %76, %cst_45 [1] : vector<32x32xf32> to vector<32xf32>
    %78 = vector.shape_cast %77 : vector<32xf32> to vector<32x1xf32>
    %cst_46 = arith.constant 3.200000e+01 : f32
    %79 = vector.broadcast %cst_46 : f32 to vector<32x1xf32>
    %80 = arith.divf %78, %79 : vector<32x1xf32>
    %cst_47 = arith.constant dense<0xFF800000> : vector<32xf32>
    %81 = vector.multi_reduction <maximumf>, %76, %cst_47 [1] : vector<32x32xf32> to vector<32xf32>
    %82 = vector.shape_cast %81 : vector<32xf32> to vector<32x1xf32>
    %c0_48 = arith.constant 0 : index
    %c0_49 = arith.constant 0 : index
    %c0_50 = arith.constant 0 : index
    %83 = vector.load %arg8[%c0_48, %c0_49, %c0_50] : memref<2x32x32xf32, #tpu.memory_space<vmem>>, vector<1x32x32xf32>
    %84 = vector.shape_cast %83 : vector<1x32x32xf32> to vector<32x32xf32>
    %cst_51 = arith.constant dense<0.000000e+00> : vector<32x1xf32>
    %85 = tpu.matmul %84, %80, %cst_51 {dimension_numbers = #tpu.dot_dimension_numbers<[1], [0], [0], [1], [0, 0, 1, 1], [], []>} : vector<32x32xf32>, vector<32x1xf32>, vector<32x1xf32> -> vector<32x1xf32>
    %c1_52 = arith.constant 1 : index
    %c0_53 = arith.constant 0 : index
    %c0_54 = arith.constant 0 : index
    %86 = vector.load %arg8[%c1_52, %c0_53, %c0_54] : memref<2x32x32xf32, #tpu.memory_space<vmem>>, vector<1x32x32xf32>
    %87 = vector.shape_cast %86 : vector<1x32x32xf32> to vector<32x32xf32>
    %cst_55 = arith.constant dense<0.000000e+00> : vector<32x1xf32>
    %88 = tpu.matmul %87, %82, %cst_55 {dimension_numbers = #tpu.dot_dimension_numbers<[1], [0], [0], [1], [0, 0, 1, 1], [], []>} : vector<32x32xf32>, vector<32x1xf32>, vector<32x1xf32> -> vector<32x1xf32>
    %89 = arith.addf %85, %88 : vector<32x1xf32>
    %c0_56 = arith.constant 0 : index
    %c0_57 = arith.constant 0 : index
    %90 = vector.load %arg9[%c0_56, %c0_57] : memref<1x1xf32, #tpu.memory_space<vmem>>, vector<1x1xf32>
    %91 = vector.broadcast %90 : vector<1x1xf32> to vector<32x1xf32>
    %92 = arith.addf %89, %91 : vector<32x1xf32>
    %93 = arith.negf %92 : vector<32x1xf32>
    %94 = math.exp %93 : vector<32x1xf32>
    %cst_58 = arith.constant 1.000000e+00 : f32
    %95 = vector.broadcast %cst_58 : f32 to vector<32x1xf32>
    %96 = arith.addf %95, %94 : vector<32x1xf32>
    %97 = arith.divf %95, %96 : vector<32x1xf32>
    %98 = vector.broadcast %97 : vector<32x1xf32> to vector<32x32xf32>
    %99 = arith.mulf %76, %98 : vector<32x32xf32>
    %c0_59 = arith.constant 0 : index
    %c0_60 = arith.constant 0 : index
    %100 = vector.load %arg10[%c0_59, %c0_60] : memref<16x32xf32, #tpu.memory_space<vmem>>, vector<16x32xf32>
    %cst_61 = arith.constant dense<0.000000e+00> : vector<16x32xf32>
    %101 = tpu.matmul %100, %99, %cst_61 {dimension_numbers = #tpu.dot_dimension_numbers<[1], [0], [0], [1], [0, 0, 1, 1], [], []>} : vector<16x32xf32>, vector<32x32xf32>, vector<16x32xf32> -> vector<16x32xf32>
    %cst_62 = arith.constant 0.000000e+00 : f32
    %102 = vector.broadcast %cst_62 : f32 to vector<2x32xf32>
    %103 = tpu.concatenate %102, %101, %102 in 0 : vector<2x32xf32>, vector<16x32xf32>, vector<2x32xf32> -> vector<20x32xf32>
    %104 = vector.extract_strided_slice %103 {offsets = [0, 0], sizes = [16, 32], strides = [1, 1]} : vector<20x32xf32> to vector<16x32xf32>
    %c0_63 = arith.constant 0 : index
    %c0_64 = arith.constant 0 : index
    %c0_65 = arith.constant 0 : index
    %105 = vector.load %arg11[%c0_63, %c0_64, %c0_65] : memref<5x32x64xf32, #tpu.memory_space<vmem>>, vector<1x32x64xf32>
    %106 = vector.shape_cast %105 : vector<1x32x64xf32> to vector<32x64xf32>
    %cst_66 = arith.constant dense<0.000000e+00> : vector<16x64xf32>
    %107 = tpu.matmul %104, %106, %cst_66 {dimension_numbers = #tpu.dot_dimension_numbers<[1], [0], [0], [1], [0, 0, 1, 1], [], []>} : vector<16x32xf32>, vector<32x64xf32>, vector<16x64xf32> -> vector<16x64xf32>
    %108 = vector.extract_strided_slice %103 {offsets = [1, 0], sizes = [16, 32], strides = [1, 1]} : vector<20x32xf32> to vector<16x32xf32>
    %c1_67 = arith.constant 1 : index
    %c0_68 = arith.constant 0 : index
    %c0_69 = arith.constant 0 : index
    %109 = vector.load %arg11[%c1_67, %c0_68, %c0_69] : memref<5x32x64xf32, #tpu.memory_space<vmem>>, vector<1x32x64xf32>
    %110 = vector.shape_cast %109 : vector<1x32x64xf32> to vector<32x64xf32>
    %cst_70 = arith.constant dense<0.000000e+00> : vector<16x64xf32>
    %111 = tpu.matmul %108, %110, %cst_70 {dimension_numbers = #tpu.dot_dimension_numbers<[1], [0], [0], [1], [0, 0, 1, 1], [], []>} : vector<16x32xf32>, vector<32x64xf32>, vector<16x64xf32> -> vector<16x64xf32>
    %112 = arith.addf %107, %111 : vector<16x64xf32>
    %113 = vector.extract_strided_slice %103 {offsets = [2, 0], sizes = [16, 32], strides = [1, 1]} : vector<20x32xf32> to vector<16x32xf32>
    %c2_71 = arith.constant 2 : index
    %c0_72 = arith.constant 0 : index
    %c0_73 = arith.constant 0 : index
    %114 = vector.load %arg11[%c2_71, %c0_72, %c0_73] : memref<5x32x64xf32, #tpu.memory_space<vmem>>, vector<1x32x64xf32>
    %115 = vector.shape_cast %114 : vector<1x32x64xf32> to vector<32x64xf32>
    %cst_74 = arith.constant dense<0.000000e+00> : vector<16x64xf32>
    %116 = tpu.matmul %113, %115, %cst_74 {dimension_numbers = #tpu.dot_dimension_numbers<[1], [0], [0], [1], [0, 0, 1, 1], [], []>} : vector<16x32xf32>, vector<32x64xf32>, vector<16x64xf32> -> vector<16x64xf32>
    %117 = arith.addf %112, %116 : vector<16x64xf32>
    %118 = vector.extract_strided_slice %103 {offsets = [3, 0], sizes = [16, 32], strides = [1, 1]} : vector<20x32xf32> to vector<16x32xf32>
    %c3_75 = arith.constant 3 : index
    %c0_76 = arith.constant 0 : index
    %c0_77 = arith.constant 0 : index
    %119 = vector.load %arg11[%c3_75, %c0_76, %c0_77] : memref<5x32x64xf32, #tpu.memory_space<vmem>>, vector<1x32x64xf32>
    %120 = vector.shape_cast %119 : vector<1x32x64xf32> to vector<32x64xf32>
    %cst_78 = arith.constant dense<0.000000e+00> : vector<16x64xf32>
    %121 = tpu.matmul %118, %120, %cst_78 {dimension_numbers = #tpu.dot_dimension_numbers<[1], [0], [0], [1], [0, 0, 1, 1], [], []>} : vector<16x32xf32>, vector<32x64xf32>, vector<16x64xf32> -> vector<16x64xf32>
    %122 = arith.addf %117, %121 : vector<16x64xf32>
    %123 = vector.extract_strided_slice %103 {offsets = [4, 0], sizes = [16, 32], strides = [1, 1]} : vector<20x32xf32> to vector<16x32xf32>
    %c4_79 = arith.constant 4 : index
    %c0_80 = arith.constant 0 : index
    %c0_81 = arith.constant 0 : index
    %124 = vector.load %arg11[%c4_79, %c0_80, %c0_81] : memref<5x32x64xf32, #tpu.memory_space<vmem>>, vector<1x32x64xf32>
    %125 = vector.shape_cast %124 : vector<1x32x64xf32> to vector<32x64xf32>
    %cst_82 = arith.constant dense<0.000000e+00> : vector<16x64xf32>
    %126 = tpu.matmul %123, %125, %cst_82 {dimension_numbers = #tpu.dot_dimension_numbers<[1], [0], [0], [1], [0, 0, 1, 1], [], []>} : vector<16x32xf32>, vector<32x64xf32>, vector<16x64xf32> -> vector<16x64xf32>
    %127 = arith.addf %122, %126 : vector<16x64xf32>
    %c0_83 = arith.constant 0 : index
    %c0_84 = arith.constant 0 : index
    %128 = vector.load %arg12[%c0_83, %c0_84] : memref<1x64xf32, #tpu.memory_space<vmem>>, vector<1x64xf32>
    %129 = vector.broadcast %128 : vector<1x64xf32> to vector<16x64xf32>
    %130 = arith.addf %127, %129 : vector<16x64xf32>
    %cst_85 = arith.constant 0.000000e+00 : f32
    %131 = vector.broadcast %cst_85 : f32 to vector<16x64xf32>
    %132 = arith.cmpf oge, %130, %131 : vector<16x64xf32>
    %cst_86 = arith.constant 0.00999999977 : f32
    %133 = vector.broadcast %cst_86 : f32 to vector<16x64xf32>
    %134 = arith.mulf %133, %130 : vector<16x64xf32>
    %135 = arith.select %132, %130, %134 : vector<16x64xi1>, vector<16x64xf32>
    %cst_87 = arith.constant dense<0.000000e+00> : vector<64xf32>
    %136 = vector.multi_reduction <add>, %135, %cst_87 [0] : vector<16x64xf32> to vector<64xf32>
    %137 = vector.shape_cast %136 : vector<64xf32> to vector<1x64xf32>
    %cst_88 = arith.constant 1.600000e+01 : f32
    %138 = vector.broadcast %cst_88 : f32 to vector<1x64xf32>
    %139 = arith.divf %137, %138 : vector<1x64xf32>
    %cst_89 = arith.constant dense<0xFF800000> : vector<64xf32>
    %140 = vector.multi_reduction <maximumf>, %135, %cst_89 [0] : vector<16x64xf32> to vector<64xf32>
    %141 = vector.shape_cast %140 : vector<64xf32> to vector<1x64xf32>
    %142 = tpu.concatenate %139, %141 in 0 : vector<1x64xf32>, vector<1x64xf32> -> vector<2x64xf32>
    %c0_90 = arith.constant 0 : index
    %c0_91 = arith.constant 0 : index
    %143 = vector.load %arg13[%c0_90, %c0_91] : memref<64x4xf32, #tpu.memory_space<vmem>>, vector<64x4xf32>
    %cst_92 = arith.constant dense<0.000000e+00> : vector<2x4xf32>
    %144 = tpu.matmul %142, %143, %cst_92 {dimension_numbers = #tpu.dot_dimension_numbers<[1], [0], [0], [1], [0, 0, 1, 1], [], []>} : vector<2x64xf32>, vector<64x4xf32>, vector<2x4xf32> -> vector<2x4xf32>
    %c0_93 = arith.constant 0 : index
    %c0_94 = arith.constant 0 : index
    %145 = vector.load %arg14[%c0_93, %c0_94] : memref<1x4xf32, #tpu.memory_space<vmem>>, vector<1x4xf32>
    %146 = vector.broadcast %145 : vector<1x4xf32> to vector<2x4xf32>
    %147 = arith.addf %144, %146 : vector<2x4xf32>
    %cst_95 = arith.constant 0.000000e+00 : f32
    %148 = vector.broadcast %cst_95 : f32 to vector<2x4xf32>
    %149 = arith.cmpf oge, %147, %148 : vector<2x4xf32>
    %cst_96 = arith.constant 0.00999999977 : f32
    %150 = vector.broadcast %cst_96 : f32 to vector<2x4xf32>
    %151 = arith.mulf %150, %147 : vector<2x4xf32>
    %152 = arith.select %149, %147, %151 : vector<2x4xi1>, vector<2x4xf32>
    %c0_97 = arith.constant 0 : index
    %c0_98 = arith.constant 0 : index
    %153 = vector.load %arg15[%c0_97, %c0_98] : memref<4x64xf32, #tpu.memory_space<vmem>>, vector<4x64xf32>
    %cst_99 = arith.constant dense<0.000000e+00> : vector<2x64xf32>
    %154 = tpu.matmul %152, %153, %cst_99 {dimension_numbers = #tpu.dot_dimension_numbers<[1], [0], [0], [1], [0, 0, 1, 1], [], []>} : vector<2x4xf32>, vector<4x64xf32>, vector<2x64xf32> -> vector<2x64xf32>
    %c0_100 = arith.constant 0 : index
    %c0_101 = arith.constant 0 : index
    %155 = vector.load %arg16[%c0_100, %c0_101] : memref<1x64xf32, #tpu.memory_space<vmem>>, vector<1x64xf32>
    %156 = vector.broadcast %155 : vector<1x64xf32> to vector<2x64xf32>
    %157 = arith.addf %154, %156 : vector<2x64xf32>
    %cst_102 = arith.constant dense<0.000000e+00> : vector<64xf32>
    %158 = vector.multi_reduction <add>, %157, %cst_102 [0] : vector<2x64xf32> to vector<64xf32>
    %159 = vector.shape_cast %158 : vector<64xf32> to vector<1x64xf32>
    %160 = arith.negf %159 : vector<1x64xf32>
    %161 = math.exp %160 : vector<1x64xf32>
    %cst_103 = arith.constant 1.000000e+00 : f32
    %162 = vector.broadcast %cst_103 : f32 to vector<1x64xf32>
    %163 = arith.addf %162, %161 : vector<1x64xf32>
    %164 = arith.divf %162, %163 : vector<1x64xf32>
    %165 = vector.broadcast %164 : vector<1x64xf32> to vector<16x64xf32>
    %166 = arith.mulf %135, %165 : vector<16x64xf32>
    %cst_104 = arith.constant dense<0.000000e+00> : vector<16xf32>
    %167 = vector.multi_reduction <add>, %166, %cst_104 [1] : vector<16x64xf32> to vector<16xf32>
    %168 = vector.shape_cast %167 : vector<16xf32> to vector<16x1xf32>
    %cst_105 = arith.constant 6.400000e+01 : f32
    %169 = vector.broadcast %cst_105 : f32 to vector<16x1xf32>
    %170 = arith.divf %168, %169 : vector<16x1xf32>
    %cst_106 = arith.constant dense<0xFF800000> : vector<16xf32>
    %171 = vector.multi_reduction <maximumf>, %166, %cst_106 [1] : vector<16x64xf32> to vector<16xf32>
    %172 = vector.shape_cast %171 : vector<16xf32> to vector<16x1xf32>
    %c0_107 = arith.constant 0 : index
    %c0_108 = arith.constant 0 : index
    %c0_109 = arith.constant 0 : index
    %173 = vector.load %arg17[%c0_107, %c0_108, %c0_109] : memref<2x16x16xf32, #tpu.memory_space<vmem>>, vector<1x16x16xf32>
    %174 = vector.shape_cast %173 : vector<1x16x16xf32> to vector<16x16xf32>
    %cst_110 = arith.constant dense<0.000000e+00> : vector<16x1xf32>
    %175 = tpu.matmul %174, %170, %cst_110 {dimension_numbers = #tpu.dot_dimension_numbers<[1], [0], [0], [1], [0, 0, 1, 1], [], []>} : vector<16x16xf32>, vector<16x1xf32>, vector<16x1xf32> -> vector<16x1xf32>
    %c1_111 = arith.constant 1 : index
    %c0_112 = arith.constant 0 : index
    %c0_113 = arith.constant 0 : index
    %176 = vector.load %arg17[%c1_111, %c0_112, %c0_113] : memref<2x16x16xf32, #tpu.memory_space<vmem>>, vector<1x16x16xf32>
    %177 = vector.shape_cast %176 : vector<1x16x16xf32> to vector<16x16xf32>
    %cst_114 = arith.constant dense<0.000000e+00> : vector<16x1xf32>
    %178 = tpu.matmul %177, %172, %cst_114 {dimension_numbers = #tpu.dot_dimension_numbers<[1], [0], [0], [1], [0, 0, 1, 1], [], []>} : vector<16x16xf32>, vector<16x1xf32>, vector<16x1xf32> -> vector<16x1xf32>
    %179 = arith.addf %175, %178 : vector<16x1xf32>
    %c0_115 = arith.constant 0 : index
    %c0_116 = arith.constant 0 : index
    %180 = vector.load %arg18[%c0_115, %c0_116] : memref<1x1xf32, #tpu.memory_space<vmem>>, vector<1x1xf32>
    %181 = vector.broadcast %180 : vector<1x1xf32> to vector<16x1xf32>
    %182 = arith.addf %179, %181 : vector<16x1xf32>
    %183 = arith.negf %182 : vector<16x1xf32>
    %184 = math.exp %183 : vector<16x1xf32>
    %cst_117 = arith.constant 1.000000e+00 : f32
    %185 = vector.broadcast %cst_117 : f32 to vector<16x1xf32>
    %186 = arith.addf %185, %184 : vector<16x1xf32>
    %187 = arith.divf %185, %186 : vector<16x1xf32>
    %188 = vector.broadcast %187 : vector<16x1xf32> to vector<16x64xf32>
    %189 = arith.mulf %166, %188 : vector<16x64xf32>
    %c0_118 = arith.constant 0 : index
    %c0_119 = arith.constant 0 : index
    %190 = vector.load %arg19[%c0_118, %c0_119] : memref<8x16xf32, #tpu.memory_space<vmem>>, vector<8x16xf32>
    %cst_120 = arith.constant dense<0.000000e+00> : vector<8x64xf32>
    %191 = tpu.matmul %190, %189, %cst_120 {dimension_numbers = #tpu.dot_dimension_numbers<[1], [0], [0], [1], [0, 0, 1, 1], [], []>} : vector<8x16xf32>, vector<16x64xf32>, vector<8x64xf32> -> vector<8x64xf32>
    %cst_121 = arith.constant 0.000000e+00 : f32
    %192 = vector.broadcast %cst_121 : f32 to vector<1x64xf32>
    %193 = tpu.concatenate %192, %191, %192 in 0 : vector<1x64xf32>, vector<8x64xf32>, vector<1x64xf32> -> vector<10x64xf32>
    %194 = vector.extract_strided_slice %193 {offsets = [0, 0], sizes = [8, 64], strides = [1, 1]} : vector<10x64xf32> to vector<8x64xf32>
    %c0_122 = arith.constant 0 : index
    %c0_123 = arith.constant 0 : index
    %c0_124 = arith.constant 0 : index
    %195 = vector.load %arg20[%c0_122, %c0_123, %c0_124] : memref<3x64x128xf32, #tpu.memory_space<vmem>>, vector<1x64x128xf32>
    %196 = vector.shape_cast %195 : vector<1x64x128xf32> to vector<64x128xf32>
    %cst_125 = arith.constant dense<0.000000e+00> : vector<8x128xf32>
    %197 = tpu.matmul %194, %196, %cst_125 {dimension_numbers = #tpu.dot_dimension_numbers<[1], [0], [0], [1], [0, 0, 1, 1], [], []>} : vector<8x64xf32>, vector<64x128xf32>, vector<8x128xf32> -> vector<8x128xf32>
    %198 = vector.extract_strided_slice %193 {offsets = [1, 0], sizes = [8, 64], strides = [1, 1]} : vector<10x64xf32> to vector<8x64xf32>
    %c1_126 = arith.constant 1 : index
    %c0_127 = arith.constant 0 : index
    %c0_128 = arith.constant 0 : index
    %199 = vector.load %arg20[%c1_126, %c0_127, %c0_128] : memref<3x64x128xf32, #tpu.memory_space<vmem>>, vector<1x64x128xf32>
    %200 = vector.shape_cast %199 : vector<1x64x128xf32> to vector<64x128xf32>
    %cst_129 = arith.constant dense<0.000000e+00> : vector<8x128xf32>
    %201 = tpu.matmul %198, %200, %cst_129 {dimension_numbers = #tpu.dot_dimension_numbers<[1], [0], [0], [1], [0, 0, 1, 1], [], []>} : vector<8x64xf32>, vector<64x128xf32>, vector<8x128xf32> -> vector<8x128xf32>
    %202 = arith.addf %197, %201 : vector<8x128xf32>
    %203 = vector.extract_strided_slice %193 {offsets = [2, 0], sizes = [8, 64], strides = [1, 1]} : vector<10x64xf32> to vector<8x64xf32>
    %c2_130 = arith.constant 2 : index
    %c0_131 = arith.constant 0 : index
    %c0_132 = arith.constant 0 : index
    %204 = vector.load %arg20[%c2_130, %c0_131, %c0_132] : memref<3x64x128xf32, #tpu.memory_space<vmem>>, vector<1x64x128xf32>
    %205 = vector.shape_cast %204 : vector<1x64x128xf32> to vector<64x128xf32>
    %cst_133 = arith.constant dense<0.000000e+00> : vector<8x128xf32>
    %206 = tpu.matmul %203, %205, %cst_133 {dimension_numbers = #tpu.dot_dimension_numbers<[1], [0], [0], [1], [0, 0, 1, 1], [], []>} : vector<8x64xf32>, vector<64x128xf32>, vector<8x128xf32> -> vector<8x128xf32>
    %207 = arith.addf %202, %206 : vector<8x128xf32>
    %c0_134 = arith.constant 0 : index
    %c0_135 = arith.constant 0 : index
    %208 = vector.load %arg21[%c0_134, %c0_135] : memref<1x128xf32, #tpu.memory_space<vmem>>, vector<1x128xf32>
    %209 = vector.broadcast %208 : vector<1x128xf32> to vector<8x128xf32>
    %210 = arith.addf %207, %209 : vector<8x128xf32>
    %cst_136 = arith.constant 0.000000e+00 : f32
    %211 = vector.broadcast %cst_136 : f32 to vector<8x128xf32>
    %212 = arith.cmpf oge, %210, %211 : vector<8x128xf32>
    %cst_137 = arith.constant 0.00999999977 : f32
    %213 = vector.broadcast %cst_137 : f32 to vector<8x128xf32>
    %214 = arith.mulf %213, %210 : vector<8x128xf32>
    %215 = arith.select %212, %210, %214 : vector<8x128xi1>, vector<8x128xf32>
    %c0_138 = arith.constant 0 : index
    %c0_139 = arith.constant 0 : index
    %216 = vector.load %arg22[%c0_138, %c0_139] : memref<4x8xf32, #tpu.memory_space<vmem>>, vector<4x8xf32>
    %cst_140 = arith.constant dense<0.000000e+00> : vector<4x128xf32>
    %217 = tpu.matmul %216, %215, %cst_140 {dimension_numbers = #tpu.dot_dimension_numbers<[1], [0], [0], [1], [0, 0, 1, 1], [], []>} : vector<4x8xf32>, vector<8x128xf32>, vector<4x128xf32> -> vector<4x128xf32>
    %c0_141 = arith.constant 0 : index
    %c0_142 = arith.constant 0 : index
    %218 = vector.load %arg24[%c0_141, %c0_142] : memref<1x128xf32, #tpu.memory_space<vmem>>, vector<1x128xf32>
    %219 = vector.extract_strided_slice %217 {offsets = [0, 0], sizes = [1, 128], strides = [1, 1]} : vector<4x128xf32> to vector<1x128xf32>
    %c0_143 = arith.constant 0 : index
    %c0_144 = arith.constant 0 : index
    %c0_145 = arith.constant 0 : index
    %220 = vector.load %arg23[%c0_143, %c0_144, %c0_145] : memref<4x128x128xf32, #tpu.memory_space<vmem>>, vector<1x128x128xf32>
    %221 = vector.shape_cast %220 : vector<1x128x128xf32> to vector<128x128xf32>
    %cst_146 = arith.constant dense<0.000000e+00> : vector<1x128xf32>
    %222 = tpu.matmul %219, %221, %cst_146 {dimension_numbers = #tpu.dot_dimension_numbers<[1], [0], [0], [1], [0, 0, 1, 1], [], []>} : vector<1x128xf32>, vector<128x128xf32>, vector<1x128xf32> -> vector<1x128xf32>
    %223 = arith.addf %218, %222 : vector<1x128xf32>
    %224 = vector.extract_strided_slice %217 {offsets = [1, 0], sizes = [1, 128], strides = [1, 1]} : vector<4x128xf32> to vector<1x128xf32>
    %c1_147 = arith.constant 1 : index
    %c0_148 = arith.constant 0 : index
    %c0_149 = arith.constant 0 : index
    %225 = vector.load %arg23[%c1_147, %c0_148, %c0_149] : memref<4x128x128xf32, #tpu.memory_space<vmem>>, vector<1x128x128xf32>
    %226 = vector.shape_cast %225 : vector<1x128x128xf32> to vector<128x128xf32>
    %cst_150 = arith.constant dense<0.000000e+00> : vector<1x128xf32>
    %227 = tpu.matmul %224, %226, %cst_150 {dimension_numbers = #tpu.dot_dimension_numbers<[1], [0], [0], [1], [0, 0, 1, 1], [], []>} : vector<1x128xf32>, vector<128x128xf32>, vector<1x128xf32> -> vector<1x128xf32>
    %228 = arith.addf %223, %227 : vector<1x128xf32>
    %229 = vector.extract_strided_slice %217 {offsets = [2, 0], sizes = [1, 128], strides = [1, 1]} : vector<4x128xf32> to vector<1x128xf32>
    %c2_151 = arith.constant 2 : index
    %c0_152 = arith.constant 0 : index
    %c0_153 = arith.constant 0 : index
    %230 = vector.load %arg23[%c2_151, %c0_152, %c0_153] : memref<4x128x128xf32, #tpu.memory_space<vmem>>, vector<1x128x128xf32>
    %231 = vector.shape_cast %230 : vector<1x128x128xf32> to vector<128x128xf32>
    %cst_154 = arith.constant dense<0.000000e+00> : vector<1x128xf32>
    %232 = tpu.matmul %229, %231, %cst_154 {dimension_numbers = #tpu.dot_dimension_numbers<[1], [0], [0], [1], [0, 0, 1, 1], [], []>} : vector<1x128xf32>, vector<128x128xf32>, vector<1x128xf32> -> vector<1x128xf32>
    %233 = arith.addf %228, %232 : vector<1x128xf32>
    %234 = vector.extract_strided_slice %217 {offsets = [3, 0], sizes = [1, 128], strides = [1, 1]} : vector<4x128xf32> to vector<1x128xf32>
    %c3_155 = arith.constant 3 : index
    %c0_156 = arith.constant 0 : index
    %c0_157 = arith.constant 0 : index
    %235 = vector.load %arg23[%c3_155, %c0_156, %c0_157] : memref<4x128x128xf32, #tpu.memory_space<vmem>>, vector<1x128x128xf32>
    %236 = vector.shape_cast %235 : vector<1x128x128xf32> to vector<128x128xf32>
    %cst_158 = arith.constant dense<0.000000e+00> : vector<1x128xf32>
    %237 = tpu.matmul %234, %236, %cst_158 {dimension_numbers = #tpu.dot_dimension_numbers<[1], [0], [0], [1], [0, 0, 1, 1], [], []>} : vector<1x128xf32>, vector<128x128xf32>, vector<1x128xf32> -> vector<1x128xf32>
    %238 = arith.addf %233, %237 : vector<1x128xf32>
    %cst_159 = arith.constant 0.000000e+00 : f32
    %239 = vector.broadcast %cst_159 : f32 to vector<1x128xf32>
    %240 = arith.cmpf oge, %238, %239 : vector<1x128xf32>
    %cst_160 = arith.constant 0.00999999977 : f32
    %241 = vector.broadcast %cst_160 : f32 to vector<1x128xf32>
    %242 = arith.mulf %241, %238 : vector<1x128xf32>
    %243 = arith.select %240, %238, %242 : vector<1x128xi1>, vector<1x128xf32>
    %c0_161 = arith.constant 0 : index
    %c0_162 = arith.constant 0 : index
    %244 = vector.load %arg25[%c0_161, %c0_162] : memref<128x64xf32, #tpu.memory_space<vmem>>, vector<128x64xf32>
    %cst_163 = arith.constant dense<0.000000e+00> : vector<1x64xf32>
    %245 = tpu.matmul %243, %244, %cst_163 {dimension_numbers = #tpu.dot_dimension_numbers<[1], [0], [0], [1], [0, 0, 1, 1], [], []>} : vector<1x128xf32>, vector<128x64xf32>, vector<1x64xf32> -> vector<1x64xf32>
    %c0_164 = arith.constant 0 : index
    %c0_165 = arith.constant 0 : index
    %246 = vector.load %arg26[%c0_164, %c0_165] : memref<1x64xf32, #tpu.memory_space<vmem>>, vector<1x64xf32>
    %247 = arith.addf %245, %246 : vector<1x64xf32>
    %cst_166 = arith.constant 0.000000e+00 : f32
    %248 = vector.broadcast %cst_166 : f32 to vector<1x64xf32>
    %249 = arith.cmpf oge, %247, %248 : vector<1x64xf32>
    %cst_167 = arith.constant 0.00999999977 : f32
    %250 = vector.broadcast %cst_167 : f32 to vector<1x64xf32>
    %251 = arith.mulf %250, %247 : vector<1x64xf32>
    %252 = arith.select %249, %247, %251 : vector<1x64xi1>, vector<1x64xf32>
    %c0_168 = arith.constant 0 : index
    %c0_169 = arith.constant 0 : index
    %253 = vector.load %arg27[%c0_168, %c0_169] : memref<64x1xf32, #tpu.memory_space<vmem>>, vector<64x1xf32>
    %cst_170 = arith.constant dense<0.000000e+00> : vector<1x1xf32>
    %254 = tpu.matmul %252, %253, %cst_170 {dimension_numbers = #tpu.dot_dimension_numbers<[1], [0], [0], [1], [0, 0, 1, 1], [], []>} : vector<1x64xf32>, vector<64x1xf32>, vector<1x1xf32> -> vector<1x1xf32>
    %c0_171 = arith.constant 0 : index
    %c0_172 = arith.constant 0 : index
    %255 = vector.load %arg28[%c0_171, %c0_172] : memref<1x1xf32, #tpu.memory_space<vmem>>, vector<1x1xf32>
    %256 = arith.addf %254, %255 : vector<1x1xf32>
    %c0_173 = arith.constant 0 : index
    %c0_174 = arith.constant 0 : index
    %c0_175 = arith.constant 0 : index
    %257 = vector.load %arg29[%c0_173, %c0_174, %c0_175] : memref<1x1x1xf32, #tpu.memory_space<vmem>>, vector<1x1x1xf32>
    %258 = vector.shape_cast %257 : vector<1x1x1xf32> to vector<1x1xf32>
    %259 = vector.shape_cast %256 : vector<1x1xf32> to vector<1x1x1xf32>
    tpu.vector_store %arg29[%c0_173, %c0_174, %c0_175], %259 {strides = array<i32>} : memref<1x1x1xf32, #tpu.memory_space<vmem>>, vector<1x1x1xf32>,
    return
  }
  func.func @transform_0(%arg0: i32) -> (i32, i32, i32) {
    %c0_i32 = arith.constant 0 : i32
    %c0_i32_0 = arith.constant 0 : i32
    %c0_i32_1 = arith.constant 0 : i32
    return %arg0, %c0_i32, %c0_i32_0 : i32, i32, i32
  }
  func.func @transform_1(%arg0: i32) -> (i32, i32, i32) {
    %c0_i32 = arith.constant 0 : i32
    %c0_i32_0 = arith.constant 0 : i32
    %c0_i32_1 = arith.constant 0 : i32
    %c0_i32_2 = arith.constant 0 : i32
    return %c0_i32, %c0_i32_0, %c0_i32_1 : i32, i32, i32
  }
  func.func @transform_2(%arg0: i32) -> (i32, i32) {
    %c0_i32 = arith.constant 0 : i32
    %c0_i32_0 = arith.constant 0 : i32
    %c0_i32_1 = arith.constant 0 : i32
    return %c0_i32, %c0_i32_0 : i32, i32
  }
  func.func @transform_3(%arg0: i32) -> (i32, i32) {
    %c0_i32 = arith.constant 0 : i32
    %c0_i32_0 = arith.constant 0 : i32
    %c0_i32_1 = arith.constant 0 : i32
    return %c0_i32, %c0_i32_0 : i32, i32
  }
  func.func @transform_4(%arg0: i32) -> (i32, i32) {
    %c0_i32 = arith.constant 0 : i32
    %c0_i32_0 = arith.constant 0 : i32
    %c0_i32_1 = arith.constant 0 : i32
    return %c0_i32, %c0_i32_0 : i32, i32
  }
  func.func @transform_5(%arg0: i32) -> (i32, i32) {
    %c0_i32 = arith.constant 0 : i32
    %c0_i32_0 = arith.constant 0 : i32
    %c0_i32_1 = arith.constant 0 : i32
    return %c0_i32, %c0_i32_0 : i32, i32
  }
  func.func @transform_6(%arg0: i32) -> (i32, i32) {
    %c0_i32 = arith.constant 0 : i32
    %c0_i32_0 = arith.constant 0 : i32
    %c0_i32_1 = arith.constant 0 : i32
    return %c0_i32, %c0_i32_0 : i32, i32
  }
  func.func @transform_7(%arg0: i32) -> (i32, i32, i32) {
    %c0_i32 = arith.constant 0 : i32
    %c0_i32_0 = arith.constant 0 : i32
    %c0_i32_1 = arith.constant 0 : i32
    %c0_i32_2 = arith.constant 0 : i32
    return %c0_i32, %c0_i32_0, %c0_i32_1 : i32, i32, i32
  }
  func.func @transform_8(%arg0: i32) -> (i32, i32) {
    %c0_i32 = arith.constant 0 : i32
    %c0_i32_0 = arith.constant 0 : i32
    %c0_i32_1 = arith.constant 0 : i32
    return %c0_i32, %c0_i32_0 : i32, i32
  }
  func.func @transform_9(%arg0: i32) -> (i32, i32) {
    %c0_i32 = arith.constant 0 : i32
    %c0_i32_0 = arith.constant 0 : i32
    %c0_i32_1 = arith.constant 0 : i32
    return %c0_i32, %c0_i32_0 : i32, i32
  }
  func.func @transform_10(%arg0: i32) -> (i32, i32, i32) {
    %c0_i32 = arith.constant 0 : i32
    %c0_i32_0 = arith.constant 0 : i32
    %c0_i32_1 = arith.constant 0 : i32
    %c0_i32_2 = arith.constant 0 : i32
    return %c0_i32, %c0_i32_0, %c0_i32_1 : i32, i32, i32
  }
  func.func @transform_11(%arg0: i32) -> (i32, i32) {
    %c0_i32 = arith.constant 0 : i32
    %c0_i32_0 = arith.constant 0 : i32
    %c0_i32_1 = arith.constant 0 : i32
    return %c0_i32, %c0_i32_0 : i32, i32
  }
  func.func @transform_12(%arg0: i32) -> (i32, i32) {
    %c0_i32 = arith.constant 0 : i32
    %c0_i32_0 = arith.constant 0 : i32
    %c0_i32_1 = arith.constant 0 : i32
    return %c0_i32, %c0_i32_0 : i32, i32
  }
  func.func @transform_13(%arg0: i32) -> (i32, i32) {
    %c0_i32 = arith.constant 0 : i32
    %c0_i32_0 = arith.constant 0 : i32
    %c0_i32_1 = arith.constant 0 : i32
    return %c0_i32, %c0_i32_0 : i32, i32
  }
  func.func @transform_14(%arg0: i32) -> (i32, i32) {
    %c0_i32 = arith.constant 0 : i32
    %c0_i32_0 = arith.constant 0 : i32
    %c0_i32_1 = arith.constant 0 : i32
    return %c0_i32, %c0_i32_0 : i32, i32
  }
  func.func @transform_15(%arg0: i32) -> (i32, i32) {
    %c0_i32 = arith.constant 0 : i32
    %c0_i32_0 = arith.constant 0 : i32
    %c0_i32_1 = arith.constant 0 : i32
    return %c0_i32, %c0_i32_0 : i32, i32
  }
  func.func @transform_16(%arg0: i32) -> (i32, i32, i32) {
    %c0_i32 = arith.constant 0 : i32
    %c0_i32_0 = arith.constant 0 : i32
    %c0_i32_1 = arith.constant 0 : i32
    %c0_i32_2 = arith.constant 0 : i32
    return %c0_i32, %c0_i32_0, %c0_i32_1 : i32, i32, i32
  }
  func.func @transform_17(%arg0: i32) -> (i32, i32) {
    %c0_i32 = arith.constant 0 : i32
    %c0_i32_0 = arith.constant 0 : i32
    %c0_i32_1 = arith.constant 0 : i32
    return %c0_i32, %c0_i32_0 : i32, i32
  }
  func.func @transform_18(%arg0: i32) -> (i32, i32) {
    %c0_i32 = arith.constant 0 : i32
    %c0_i32_0 = arith.constant 0 : i32
    %c0_i32_1 = arith.constant 0 : i32
    return %c0_i32, %c0_i32_0 : i32, i32
  }
  func.func @transform_19(%arg0: i32) -> (i32, i32, i32) {
    %c0_i32 = arith.constant 0 : i32
    %c0_i32_0 = arith.constant 0 : i32
    %c0_i32_1 = arith.constant 0 : i32
    %c0_i32_2 = arith.constant 0 : i32
    return %c0_i32, %c0_i32_0, %c0_i32_1 : i32, i32, i32
  }
  func.func @transform_20(%arg0: i32) -> (i32, i32) {
    %c0_i32 = arith.constant 0 : i32
    %c0_i32_0 = arith.constant 0 : i32
    %c0_i32_1 = arith.constant 0 : i32
    return %c0_i32, %c0_i32_0 : i32, i32
  }
  func.func @transform_21(%arg0: i32) -> (i32, i32) {
    %c0_i32 = arith.constant 0 : i32
    %c0_i32_0 = arith.constant 0 : i32
    %c0_i32_1 = arith.constant 0 : i32
    return %c0_i32, %c0_i32_0 : i32, i32
  }
  func.func @transform_22(%arg0: i32) -> (i32, i32, i32) {
    %c0_i32 = arith.constant 0 : i32
    %c0_i32_0 = arith.constant 0 : i32
    %c0_i32_1 = arith.constant 0 : i32
    %c0_i32_2 = arith.constant 0 : i32
    return %c0_i32, %c0_i32_0, %c0_i32_1 : i32, i32, i32
  }
  func.func @transform_23(%arg0: i32) -> (i32, i32) {
    %c0_i32 = arith.constant 0 : i32
    %c0_i32_0 = arith.constant 0 : i32
    %c0_i32_1 = arith.constant 0 : i32
    return %c0_i32, %c0_i32_0 : i32, i32
  }
  func.func @transform_24(%arg0: i32) -> (i32, i32) {
    %c0_i32 = arith.constant 0 : i32
    %c0_i32_0 = arith.constant 0 : i32
    %c0_i32_1 = arith.constant 0 : i32
    return %c0_i32, %c0_i32_0 : i32, i32
  }
  func.func @transform_25(%arg0: i32) -> (i32, i32) {
    %c0_i32 = arith.constant 0 : i32
    %c0_i32_0 = arith.constant 0 : i32
    %c0_i32_1 = arith.constant 0 : i32
    return %c0_i32, %c0_i32_0 : i32, i32
  }
  func.func @transform_26(%arg0: i32) -> (i32, i32) {
    %c0_i32 = arith.constant 0 : i32
    %c0_i32_0 = arith.constant 0 : i32
    %c0_i32_1 = arith.constant 0 : i32
    return %c0_i32, %c0_i32_0 : i32, i32
  }
  func.func @transform_27(%arg0: i32) -> (i32, i32) {
    %c0_i32 = arith.constant 0 : i32
    %c0_i32_0 = arith.constant 0 : i32
    %c0_i32_1 = arith.constant 0 : i32
    return %c0_i32, %c0_i32_0 : i32, i32
  }
  func.func @transform_28(%arg0: i32) -> (i32, i32, i32) {
    %c0_i32 = arith.constant 0 : i32
    %c0_i32_0 = arith.constant 0 : i32
    %c0_i32_1 = arith.constant 0 : i32
    return %arg0, %c0_i32, %c0_i32_0 : i32, i32, i32
  }
}

</mosaic_0001>

<bundles_post_ra>
// kernel: eeg_angle_forward.1
= control target key start
LH: loop header
LB: loop body
LE: loop exit
PB: predicated region body
PF: predicated region fallthrough
CT: control target
= control target key end

     0   :  { %s4297_s0 = inlined_call_operand.vmem [shape: f32[2,32,8], index: 0, kind: input, shape index: {}]   ;;  %s4298_s1 = inlined_call_operand.vmem [shape: f32[7,8,32], index: 1, kind: input, shape index: {}]   ;;  %s4299_s2 = inlined_call_operand.vmem [shape: f32[1,32], index: 2, kind: input, shape index: {}]   ;;  %s4300_s3 = inlined_call_operand.vmem [shape: f32[32,2], index: 3, kind: input, shape index: {}]   ;;  %s4301_s4 = inlined_call_operand.vmem [shape: f32[1,2], index: 4, kind: input, shape index: {}]   ;;  %s4302_s5 = inlined_call_operand.vmem [shape: f32[2,32], index: 5, kind: input, shape index: {}]   ;;  %s4303_s6 = inlined_call_operand.hbm [shape: f32[1,32], index: 6, kind: input, shape index: {}]   ;;  %s4304_s7 = inlined_call_operand.vmem [shape: f32[2,32,32], index: 7, kind: input, shape index: {}]   ;;  %s4305_s8 = inlined_call_operand.<no memory space> [shape: f32[1,1], index: 8, kind: input, shape index: {}]   ;;  %s4306_s9 = inlined_call_operand.vmem [shape: f32[16,32], index: 9, kind: input, shape index: {}]   ;;  %s4307_s10 = inlined_call_operand.hbm [shape: f32[5,32,64], index: 10, kind: input, shape index: {}]   ;;  %s4308_s11 = inlined_call_operand.hbm [shape: f32[1,64], index: 11, kind: input, shape index: {}]   ;;  %s4309_s12 = inlined_call_operand.vmem [shape: f32[64,4], index: 12, kind: input, shape index: {}]   ;;  %s4310_s13 = inlined_call_operand.hbm [shape: f32[1,4], index: 13, kind: input, shape index: {}]   ;;  %s4311_s14 = inlined_call_operand.hbm [shape: f32[4,64], index: 14, kind: input, shape index: {}]   ;;  %s4312_s15 = inlined_call_operand.hbm [shape: f32[1,64], index: 15, kind: input, shape index: {}]   ;;  %s4313_s16 = inlined_call_operand.vmem [shape: f32[2,16,16], index: 16, kind: input, shape index: {}]   ;;  %s4314_s18 = inlined_call_operand.vmem [shape: f32[8,16], index: 18, kind: input, shape index: {}]   ;;  %s4315_s19 = inlined_call_operand.vmem [shape: f32[3,64,128], index: 19, kind: input, shape index: {}]   ;;  %s4316_s20 = inlined_call_operand.hbm [shape: f32[1,128], index: 20, kind: input, shape index: {}]   ;;  %s4317_s21 = inlined_call_operand.hbm [shape: f32[4,8], index: 21, kind: input, shape index: {}]   ;;  %s4318_s22 = inlined_call_operand.hbm [shape: f32[4,128,128], index: 22, kind: input, shape index: {}]   ;;  %s4319_s23 = inlined_call_operand.hbm [shape: f32[1,128], index: 23, kind: input, shape index: {}]   ;;  %s4320_s24 = inlined_call_operand.vmem [shape: f32[128,64], index: 24, kind: input, shape index: {}]   ;;  %s4321_s25 = inlined_call_operand.hbm [shape: f32[1,64], index: 25, kind: input, shape index: {}]   ;;  %s4322_s26 = inlined_call_operand.vmem [shape: f32[64,1], index: 26, kind: input, shape index: {}]   ;;  %s4323_s28 = inlined_call_operand.vmem [shape: f32[2,1,1], index: 28, kind: output, shape index: {}]   ;;  %s4324_s17 = inlined_call_operand.<no memory space> [shape: f32[1,1], index: 17, kind: input, shape index: {}]   ;;  %s4325_s27 = inlined_call_operand.<no memory space> [shape: f32[1,1], index: 27, kind: input, shape index: {}]  }
   0x1   :  { %4333 = sst [smem:[#allocation29_spill]] %s4297_s0  ;;  %v35_v1 = vstv %s4324_s17  ;;  %v37_v2 = vstv %s4325_s27 }
   0x2   :  { %4334 = sst [smem:[#allocation30_spill]] %s4298_s1  ;;  %36 = vst [vmem:[#allocation3] sm:$0x1] %v35_v1 }
   0x3   :  { %4335 = sst [smem:[#allocation31_spill]] %s4299_s2  ;;  %38 = vst [vmem:[#allocation4] sm:$0x1] %v37_v2 }
   0x4   :  { %4336 = sst [smem:[#allocation32_spill]] %s4300_s3 }
   0x5   :  { %4337 = sst [smem:[#allocation33_spill]] %s4301_s4 }
   0x6   :  { %4338 = sst [smem:[#allocation34_spill]] %s4302_s5 }
   0x7   :  { %4339 = sst [smem:[#allocation35_spill]] %s4303_s6 }
   0x8   :  { %4340 = sst [smem:[#allocation36_spill]] %s4304_s7 }
   0x9   :  { %4341 = sst [smem:[#allocation37_spill]] %s4305_s8 }
   0xa   :  { %4342 = sst [smem:[#allocation38_spill]] %s4306_s9 }
   0xb   :  { %4343 = sst [smem:[#allocation39_spill]] %s4307_s10 }
   0xc   :  { %4344 = sst [smem:[#allocation40_spill]] %s4308_s11 }
   0xd   :  { %4345 = sst [smem:[#allocation41_spill]] %s4309_s12 }
   0xe   :  { %4346 = sst [smem:[#allocation42_spill]] %s4310_s13 }
   0xf   :  { %4347 = sst [smem:[#allocation43_spill]] %s4312_s15 }
  0x10   :  { %s4348_s9 = sld [smem:[#allocation37_spill]] }
  0x16   :  { %v33_v0 = vstv %s4348_s9 }
  0x17   :  { %34 = vst [vmem:[#allocation2] sm:$0x1] %v33_v0 }
  0x18   :  { %39 = vsyncpa [#allocation6], 0 }
  0x19   :  { %40 = vsyncpa [#allocation8], 0 }
  0x1a   :  { %41 = vsyncpa [#allocation11], 0 }
  0x1b   :  { %42 = vsyncpa [#allocation14], 0 }
  0x1c   :  { %43 = vsyncpa [#allocation17], 0 }
  0x1d   :  { %44 = vsyncpa [#allocation20], 0  ;;  %s3667_s0 = smov 0  }
  0x1e LB: > { %4349 = sst [smem:[#allocation28_spill]] %s3494_s0  ;;  %s3676_s2 = sadd.s32 4294967295, %s3494_s0   ;;  %s3494_s0 = sphi %s3667_s0, %s50_s0  }
  0x1f   : > { %s4350_s29 = sld [smem:[#allocation39_spill]]  ;;  %p2828_p0 = scmp.ge.s32.totalorder %s3494_s0, 1 }
  0x20   : > { %p674_p1 = scmp.lt.s32.totalorder %s3494_s0, 3  ;;  %p3037_p2 = scmp.eq.s32.totalorder %s3676_s2, 0 }
  0x21   : > { %s3496_s12 = smov [#allocation7]   ;;  %s4352_s13 = sld [smem:[#allocation42_spill]] }
  0x22   : > { %p3681_p3 = pnand %p2828_p0, %p674_p1  ;;  %s723_s1 = sshll.u32 %s3496_s12, 4  ;;  %s724_s1 = int_to_ptr.vmem [resolvable:$true] %s723_s1 }
  0x23   : > { %s3497_s30 = smov [#allocation10]   ;;  %s4354_s15 = sld [smem:[#allocation43_spill]] }
  0x24   : > { %p3003_p4 = pneg %p3681_p3  ;;  %s753_s3 = sshll.u32 %s3497_s30, 4  ;;  %s754_s3 = int_to_ptr.vmem [resolvable:$true] %s753_s3 }
  0x25   : > { %s721_s27 = sshll.u32 %s4350_s29, 4  ;;  %s4332_s11 = smov 128   ;;  %s722_s27 = int_to_ptr.hbm [resolvable:$true] %s721_s27 }
  0x26   : > { %p3692_p5 = pnand %p3037_p2, %p3003_p4  ;;  %s3499_s29 = smov 8  }
  0x27   : > { %s751_s5 = sshll.u32 %s4352_s13, 4  ;;  %s3500_s12 = smov [#allocation13]   ;;  %s752_s5 = int_to_ptr.hbm [resolvable:$true] %s751_s5 }
  0x28   : > { %3009 = dma.hbm_to_vmem [thread:$0]  (!%p3692_p5), %s722_s27, 2560, %s724_s1, [#allocation8], %s4332_s11, %s4332_s11, %s3499_s29  }
  0x29   : > { %s775_s17 = sshll.u32 %s4354_s15, 4  ;;  %s777_s4 = sshll.u32 %s3500_s12, 4  ;;  %s776_s17 = int_to_ptr.hbm [resolvable:$true] %s775_s17  ;;  %s778_s4 = int_to_ptr.vmem [resolvable:$true] %s777_s4 }
  0x2a   : > { %3015 = dma.hbm_to_vmem [thread:$0]  (!%p3692_p5), %s752_s5, 16, %s754_s3, [#allocation11]  }
  0x2b   : > { %s811_s6 = sshll.u32 %s4317_s21, 4  ;;  %s837_s15 = sshll.u32 %s4319_s23, 4  ;;  %s812_s6 = int_to_ptr.hbm [resolvable:$true] %s811_s6  ;;  %s838_s15 = int_to_ptr.hbm [resolvable:$true] %s837_s15 }
  0x2c   : > { %3021 = dma.hbm_to_vmem [thread:$0]  (!%p3692_p5), %s776_s17, 16, %s778_s4, [#allocation14]  }
  0x2d   : > { %s3501_s0 = smov [#allocation16]   ;;  %s3502_s1 = smov [#allocation19]  }
  0x2e   : > { %s813_s27 = sshll.u32 %s3501_s0, 4  ;;  %s839_s5 = sshll.u32 %s3502_s1, 4  ;;  %s814_s27 = int_to_ptr.vmem [resolvable:$true] %s813_s27  ;;  %s840_s5 = int_to_ptr.vmem [resolvable:$true] %s839_s5 }
  0x2f   : > { %3027 = dma.hbm_to_vmem [thread:$0]  (!%p3692_p5), %s812_s6, 64, %s814_s27, [#allocation17]  }
  0x30   : > { %s4355_s8 = sld [smem:[#allocation35_spill]]  ;;  %s3503_s0 = smov [#allocation5]  }
  0x31   : > { %3033 = dma.hbm_to_vmem [thread:$0]  (!%p3692_p5), %s838_s15, 16, %s840_s5, [#allocation20]  }
  0x32   : > { %s4356_s4 = sld [smem:[#allocation40_spill]]  ;;  %s703_s11 = sshll.u32 %s3503_s0, 4  ;;  %s704_s11 = int_to_ptr.vmem [resolvable:$true] %s703_s11 }
  0x33   : > { %s3504_s6 = smov [#allocation9]   ;;  %s763_s12 = sshll.u32 %s4311_s14, 4  ;;  %s764_s12 = int_to_ptr.hbm [resolvable:$true] %s763_s12 }
  0x34   : > { %s738_s27 = sshll.u32 %s3504_s6, 4  ;;  %s3505_s13 = smov [#allocation12]   ;;  %s739_s27 = int_to_ptr.vmem [resolvable:$true] %s738_s27 }
  0x35   : > { %s765_s17 = sshll.u32 %s3505_s13, 4  ;;  %s822_s6 = sshll.u32 %s4318_s22, 4  ;;  %s766_s17 = int_to_ptr.vmem [resolvable:$true] %s765_s17  ;;  %s823_s6 = int_to_ptr.hbm [resolvable:$true] %s822_s6 }
  0x36   : > { %s701_s30 = sshll.u32 %s4355_s8, 4  ;;  %s799_s8 = sshll.u32 %s4316_s20, 4  ;;  %s702_s30 = int_to_ptr.hbm [resolvable:$true] %s701_s30  ;;  %s800_s8 = int_to_ptr.hbm [resolvable:$true] %s799_s8 }
  0x37   : > { %3006 = dma.hbm_to_vmem [thread:$0]  (!%p3692_p5), %s702_s30, 16, %s704_s11, [#allocation6]  }
  0x38   : > { %s736_s10 = sshll.u32 %s4356_s4, 4  ;;  %s3506_s11 = smov [#allocation15]   ;;  %s737_s10 = int_to_ptr.hbm [resolvable:$true] %s736_s10 }
  0x39   : > { %3012 = dma.hbm_to_vmem [thread:$0]  (!%p3692_p5), %s737_s10, 16, %s739_s27, [#allocation8]  }
  0x3a   : > { %3018 = dma.hbm_to_vmem [thread:$0]  (!%p3692_p5), %s764_s12, 64, %s766_s17, [#allocation11]  }
  0x3b   : > { %s801_s30 = sshll.u32 %s3506_s11, 4  ;;  %s852_s1 = sshll.u32 %s4321_s25, 4  ;;  %s802_s30 = int_to_ptr.vmem [resolvable:$true] %s801_s30  ;;  %s853_s1 = int_to_ptr.hbm [resolvable:$true] %s852_s1 }
  0x3c   : > { %3024 = dma.hbm_to_vmem [thread:$0]  (!%p3692_p5), %s800_s8, 16, %s802_s30, [#allocation14]  }
  0x3d   : > { %s3507_s3 = smov [#allocation18]   ;;  %s4357_s12 = smov 128  }
  0x3e   : > { %s824_s15 = sshll.u32 %s3507_s3, 4  ;;  %s3508_s5 = smov [#allocation21]   ;;  %s825_s15 = int_to_ptr.vmem [resolvable:$true] %s824_s15 }
  0x3f   : > { %3030 = dma.hbm_to_vmem [thread:$0]  (!%p3692_p5), %s823_s6, 8192, %s825_s15, [#allocation17], %s4357_s12, %s4357_s12, %s3499_s29  }
  0x40   : > { %s854_s13 = sshll.u32 %s3508_s5, 4  ;;  %881 = sbr.rel (%p3681_p3) target bundleno = 2921 (0xb69), region = 132  ;;  %s855_s13 = int_to_ptr.vmem [resolvable:$true] %s854_s13 }
  0x41   : > { %3036 = dma.hbm_to_vmem [thread:$0]  (!%p3692_p5), %s853_s1, 16, %s855_s13, [#allocation20]  }
  0x45   : > { %3469 = dma.done.wait (%p3037_p2), [#allocation6], 16  }
  0x46   : > { %3471 = vsyncadd (%p3037_p2), [#allocation6], 4294967280 }
  0x47   : > { %3473 = dma.done.wait (%p3037_p2), [#allocation8], 2576  }
  0x48   : > { %3475 = vsyncadd (%p3037_p2), [#allocation8], 4294964720 }
  0x49   : > { %3477 = dma.done.wait (%p3037_p2), [#allocation11], 80  }
  0x4a   : > { %3479 = vsyncadd (%p3037_p2), [#allocation11], 4294967216 }
  0x4b   : > { %3481 = dma.done.wait (%p3037_p2), [#allocation14], 32  }
  0x4c   : > { %3483 = vsyncadd (%p3037_p2), [#allocation14], 4294967264 }
  0x4d   : > { %3485 = dma.done.wait (%p3037_p2), [#allocation17], 8256  }
  0x4e   : > { %3487 = vsyncadd (%p3037_p2), [#allocation17], 4294959040 }
  0x4f   : > { %3489 = dma.done.wait (%p3037_p2), [#allocation20], 32  }
  0x50   : > { %3491 = vsyncadd (%p3037_p2), [#allocation20], 4294967264  ;;  %p1004_p6 = scmp.lt.s32.totalorder %s3676_s2, 1  ;;  %s4358_s8 = sld [smem:[#allocation29_spill]]  ;;  %vm1020_vm0 = vcmask 1042432   ;;  %vm1047_vm1 = vcmask 64512  }
  0x51   : > { %s4359_s4 = sld [smem:[#allocation30_spill]]  ;;  %vm1037_vm2 = vcmask 1046528   ;;  %vm1124_vm3 = vcmask 1045504   ;;  %vm1177_vm4 = vcmask 1044480   ;;  %vm1230_vm5 = vcmask 1043456  }
  0x52   : > { %s4369_s2 = smov (!%p1004_p6, %s3676_s2), 1  ;;  %vm1335_vm6 = vcmask 1041408   ;;  %s4361_s15 = sld [smem:[#allocation31_spill]]  ;;  %vm1406_vm10 = vcmask 261120   ;;  %vm1441_vm13 = vcmask 1040384   ;;  %vm1482_vm15 = vcmask 15360  }
  0x53   : > { %s2957_s7 = sshll.u32 %s4369_s2, 5  ;;  %s4362_s13 = sld [smem:[#allocation34_spill]] }
  0x54   : > { %s4363_s29 = sld [smem:[#allocation33_spill]] }
  0x55   : > { %s4364_s30 = sld [smem:[#allocation36_spill]] }
  0x56   : > { %s1008_s17 = scalar_lea.vmem %s4358_s8, %s2957_s7  ;;  %s4365_s6 = sld [smem:[#allocation38_spill]] }
  0x57   : > { %v1032_v3 = vld [vmem:[%s4359_s4] sm:$0xff]  ;;  %v1013_v5 = vld [vmem:[%s1008_s17 + $0x8] sm:$0xff]  ;;  %v1014_v6 = vld [vmem:[%s1008_s17 + $0x10] sm:$0xff] }
  0x58   : > { %v1012_v4 = vld [vmem:[%s1008_s17] sm:$0xff]  ;;  %1108 = vmatpush.msra.mxu1 %v1032_v3  ;;  %v1015_v7 = vld [vmem:[%s1008_s17 + $0x18] sm:$0xff]  ;;  %v1022_v9 = vrot.slane %v1013_v5, 5  ;;  %v2855_v10 = vld [vmem:[%s4359_s4 + $0x8] sm:$0xff]  ;;  %v1024_v11 = vrot.slane %v1014_v6, 5  ;;  %s4360_s17 = sld [smem:[#allocation32_spill]] }
  0x59   : > { %v1021_v8 = vrot.slane %v1012_v4, 5  ;;  %v1026_v12 = vrot.slane %v1015_v7, 5  ;;  %2958 = vmatpush.msra.mxu3 %v2855_v10  ;;  %v2864_v13 = vld [vmem:[%s4359_s4 + $0x10] sm:$0xff]  ;;  %1071 = vmatpush.msra.mxu0 %v2855_v10  ;;  %v2869_v14 = vld [vmem:[%s4359_s4 + $0x18] sm:$0xff]  ;;  %v2874_v18 = vld [vmem:[%s4359_s4 + $0x20] sm:$0xff] }
  0x5a   : > { %v2884_v15 = vld [vmem:[%s4359_s4 + $0x30] sm:$0xff]  ;;  %1157 = vmatpush.msra.mxu2 %v2864_v13  ;;  %v2879_v19 = vld [vmem:[%s4359_s4 + $0x28] sm:$0xff]  ;;  %v3815_v20 = vsel %vm1020_vm0, %v1022_v9, %v1024_v11 }
  0x5b   : > { %v3801_v16 = vsel %vm1020_vm0, %v1021_v8, %v1022_v9  ;;  %v3804_v17 = vsel %vm1020_vm0, 0.0, %v1021_v8  ;;  %1210 = vmatpush.msrb.mxu3 %v2869_v14  ;;  %v3818_v21 = vsel %vm1020_vm0, %v1024_v11, %v1026_v12  ;;  %v1041_v24 = vrot.slane %v3815_v20, 1  ;;  %1263 = vmatpush.msrb.mxu0 %v2874_v18 }
  0x5c   : > { %2860 = vmatmul.msk.f32.vlgmr.msra.gmra.mxu1 %vm1047_vm1, %v3804_v17  ;;  %v1125_v22 = vrot.slane %v3804_v17, 2  ;;  %v1126_v23 = vrot.slane %v3801_v16, 2  ;;  %1368 = vmatpush.msrb.mxu2 %v2884_v15  ;;  %v1043_v25 = vrot.slane %v3818_v21, 1  ;;  %v1038_v26 = vrot.slane %v3804_v17, 1 }
  0x5d   : > { %v1039_v27 = vrot.slane %v3801_v16, 1  ;;  %1315 = vmatpush.msrb.mxu1 %v2879_v19  ;;  %v3828_v29 = vsel %vm1020_vm0, %v1026_v12, 0.0  ;;  %v1128_v32 = vrot.slane %v3815_v20, 2  ;;  %v1130_v37 = vrot.slane %v3818_v21, 2 }
  0x5e   : > { %v1127_v28 = vsel %vm1124_vm3, %v1125_v22, %v1126_v23  ;;  %v1044_v30 = vsel %vm1037_vm2, %v1041_v24, %v1043_v25  ;;  %v1045_v33 = vrot.slane %v3828_v29, 1  ;;  %v1178_v38 = vrot.slane %v3804_v17, 3 }
  0x5f   : > { %2865 = vmatmul.msk.f32.vlgmr.msra.gmra.mxu2 %vm1047_vm1, %v1127_v28  ;;  %v1040_v31 = vsel %vm1037_vm2, %v1038_v26, %v1039_v27  ;;  %2858 = vmatmul.msk.f32.vlgmr.msra.gmra.mxu3 %vm1047_vm1, %v1044_v30  ;;  %v1129_v34 = vsel %vm1124_vm3, %v1126_v23, %v1128_v32  ;;  %v1042_v36 = vsel %vm1037_vm2, %v1039_v27, %v1041_v24  ;;  %v1179_v39 = vrot.slane %v3801_v16, 3 }
  0x60   : > { %2856 = vmatmul.msk.f32.vlgmr.msra.gmra.mxu0 %vm1047_vm1, %v1040_v31  ;;  %v1046_v35 = vsel %vm1037_vm2, %v1043_v25, %v1045_v33  ;;  %v1231_v40 = vrot.slane %v3804_v17, 4  ;;  %v1232_v41 = vrot.slane %v3801_v16, 4  ;;  %v1131_v42 = vsel %vm1124_vm3, %v1128_v32, %v1130_v37 }
  0x61   : > { %v1180_v43 = vsel %vm1177_vm4, %v1178_v38, %v1179_v39  ;;  %v1132_v45 = vrot.slane %v3828_v29, 2  ;;  %v1181_v46 = vrot.slane %v3815_v20, 3  ;;  %v1234_v47 = vrot.slane %v3815_v20, 4 }
  0x62   : > { %v1233_v44 = vsel %vm1230_vm5, %v1231_v40, %v1232_v41  ;;  %v1283_v50 = vrot.slane %v3804_v17, 5  ;;  %v1284_v51 = vrot.slane %v3801_v16, 5  ;;  %v1336_v53 = vrot.slane %v3804_v17, 6 }
  0x63   : > { %v1133_v48 = vsel %vm1124_vm3, %v1130_v37, %v1132_v45  ;;  %v1182_v49 = vsel %vm1177_vm4, %v1179_v39, %v1181_v46  ;;  %v1235_v52 = vsel %vm1230_vm5, %v1232_v41, %v1234_v47  ;;  %v1337_v54 = vrot.slane %v3801_v16, 6 }
  0x64   : > { %2861 = vmatmul.msk.f32.gmra.mxu1 %vm1047_vm1, %v3801_v16  ;;  %v1285_v55 = vsel %vm1020_vm0, %v1283_v50, %v1284_v51  ;;  %v1183_v56 = vrot.slane %v3818_v21, 3  ;;  %v1236_v57 = vrot.slane %v3818_v21, 4  ;;  %v1286_v60 = vrot.slane %v3815_v20, 5 }
  0x65   : > { %v1338_v58 = vsel %vm1335_vm6, %v1336_v53, %v1337_v54  ;;  %v1339_v62 = vrot.slane %v3815_v20, 6  ;;  %v1185_v0 = vrot.slane %v3828_v29, 3  ;;  %v1238_v1 = vrot.slane %v3828_v29, 4  ;;  %v1443_v53 = vld [vmem:[%s4360_s17] sm:$0xff] }
  0x66   : > { %v1184_v59 = vsel %vm1177_vm4, %v1181_v46, %v1183_v56  ;;  %v1237_v61 = vsel %vm1230_vm5, %v1234_v47, %v1236_v57  ;;  %v1287_v63 = vsel %vm1020_vm0, %v1284_v51, %v1286_v60  ;;  %v1288_v4 = vrot.slane %v3818_v21, 5 }
  0x67   : > { %2866 = vmatmul.msk.f32.gmra.mxu2 %vm1047_vm1, %v1129_v34  ;;  %2859 = vmatmul.msk.f32.gmra.mxu3 %vm1047_vm1, %v1046_v35  ;;  %v1340_v2 = vsel %vm1335_vm6, %v1337_v54, %v1339_v62  ;;  %v1186_v3 = vsel %vm1177_vm4, %v1183_v56, %v1185_v0  ;;  %v1239_v5 = vsel %vm1230_vm5, %v1236_v57, %v1238_v1  ;;  %v1341_v6 = vrot.slane %v3818_v21, 6  ;;  %v3087_v56 = vld [vmem:[%s4361_s15] ss:$0 sm:$0xff]  ;;  %s4366_s15 = sld [smem:[#allocation41_spill]] }
  0x68   : > { %2857 = vmatmul.msk.f32.gmra.mxu0 %vm1047_vm1, %v1042_v36  ;;  %v1289_v7 = vsel %vm1020_vm0, %v1286_v60, %v1288_v4  ;;  %v1290_v9 = vrot.slane %v3828_v29, 5  ;;  %v1343_v10 = vrot.slane %v3828_v29, 6 }
  0x69   : > { %v1342_v8 = vsel %vm1335_vm6, %v1339_v62, %v1341_v6 }
  0x6a   : > { %v1291_v11 = vsel %vm1020_vm0, %v1288_v4, %v1290_v9  ;;  %v1344_v12 = vsel %vm1335_vm6, %v1341_v6, %v1343_v10  ;;  %vm1509_vm0 = vcmask 254976  }
  0x6c   : > { %2862 = vmatmul.msk.f32.gmra.mxu1 %vm1047_vm1, %v3815_v20 }
  0x6f   : > { %2867 = vmatmul.msk.f32.gmra.mxu2 %vm1047_vm1, %v1131_v42  ;;  %2870 = vmatmul.msk.f32.vlgmr.msrb.gmra.mxu3 %vm1047_vm1, %v1180_v43  ;;  %v1446_v42 = vld [vmem:[%s4360_s17 + $0x18] sm:$0xff]  ;;  %v1445_v43 = vld [vmem:[%s4360_s17 + $0x10] sm:$0xff] }
  0x70   : > { %2875 = vmatmul.msk.f32.vlgmr.msrb.gmra.mxu0 %vm1047_vm1, %v1233_v44  ;;  %1466 = vmatpush.msra.mxu3 %v1446_v42 }
  0x72   : > { %1467 = vmatpush.msra.mxu3 %v1445_v43 }
  0x74   : > { %2863 = vmatmul.msk.f32.gmra.mxu1 %vm1047_vm1, %v3818_v21 }
  0x77   : > { %2868 = vmatmul.msk.f32.gmra.mxu2 %vm1047_vm1, %v1133_v48  ;;  %2871 = vmatmul.msk.f32.gmra.mxu3 %vm1047_vm1, %v1182_v49  ;;  %v1444_v49 = vld [vmem:[%s4360_s17 + $0x8] sm:$0xff] }
  0x78   : > { %2876 = vmatmul.msk.f32.gmra.mxu0 %vm1047_vm1, %v1235_v52  ;;  %1468 = vmatpush.msra.mxu3 %v1444_v49 }
  0x7a   : > { %1469 = vmatpush.msra.mxu3 %v1443_v53  ;;  %v1477_v53 = vld [vmem:[%s4362_s13] sm:$0x3] }
  0x7c   : > { %2880 = vmatmul.msk.f32.vlgmr.msrb.gmra.mxu1 %vm1047_vm1, %v1285_v55  ;;  %2890 = vmatpush.msk.msrb.mxu3 %vm1335_vm6, %v1477_v53 }
  0x7f   : > { %2885 = vmatmul.msk.f32.vlgmr.msrb.gmra.mxu2 %vm1047_vm1, %v1338_v58  ;;  %2872 = vmatmul.msk.f32.gmra.mxu3 %vm1047_vm1, %v1184_v59 }
  0x80   : > { %2877 = vmatmul.msk.f32.gmra.mxu0 %vm1047_vm1, %v1237_v61 }
  0x84   : > { %2881 = vmatmul.msk.f32.gmra.mxu1 %vm1047_vm1, %v1287_v63 }
  0x87   : > { %2886 = vmatmul.msk.f32.gmra.mxu2 %vm1047_vm1, %v1340_v2  ;;  %2873 = vmatmul.msk.f32.gmra.mxu3 %vm1047_vm1, %v1186_v3 }
  0x88   : > { %2878 = vmatmul.msk.f32.gmra.mxu0 %vm1047_vm1, %v1239_v5  ;;  %v3509_v5 = vmov 32.0  }
  0x89   : > { %3096 = vrcp.f32 %v3509_v5 }
  0x8c   : > { %2882 = vmatmul.msk.f32.gmra.mxu1 %vm1047_vm1, %v1289_v7 }
  0x8f   : > { %2887 = vmatmul.msk.f32.gmra.mxu2 %vm1047_vm1, %v1342_v8 }
  0x94   : > { %2883 = vmatmul.msk.f32.gmra.mxu1 %vm1047_vm1, %v1291_v11 }
  0x97   : > { %2888 = vmatmul.msk.f32.gmra.mxu2 %vm1047_vm1, %v1344_v12 }
  0xd9   : > { %v1110_v13 = vpop.f32.mrf.mxu1 }
  0xdd   : > { %v1073_v17 = vpop.f32.mrf.mxu0 }
  0xde   : > { %v1111_v31 = vadd.f32 %v1110_v13, %v1073_v17  ;;  %v3097_v13 = vpop.eup %3096 }
  0xdf   : > { %vm1425_vm12 = vweird.f32 %v3097_v13 }
  0xe1   : > { %v1113_v14 = vpop.f32.mrf.mxu1 }
  0xe2   : > { %v1159_v15 = vpop.f32.mrf.mxu2  ;;  %v1079_v16 = vpop.f32.mrf.mxu3 }
  0xe3   : > { %v1171_v35 = vadd.f32 %v1159_v15, %v1111_v31 }
  0xe5   : > { %v1076_v21 = vpop.f32.mrf.mxu0 }
  0xe6   : > { %v1114_v29 = vadd.f32 %v1113_v14, %v1076_v21  ;;  %v1421_v21 = vmul.f32 32.0, %v3097_v13 }
  0xe8   : > { %v1422_v31 = vsub.f32 1.0, %v1421_v21 }
  0xe9   : > { %v1116_v18 = vpop.f32.mrf.mxu1 }
  0xea   : > { %v1162_v19 = vpop.f32.mrf.mxu2  ;;  %v1082_v20 = vpop.f32.mrf.mxu3  ;;  %v1117_v38 = vadd.f32 %v1116_v18, %v1079_v16 }
  0xeb   : > { %v1172_v34 = vadd.f32 %v1162_v19, %v1114_v29 }
  0xed   : > { %v1265_v25 = vpop.f32.mrf.mxu0 }
  0xf1   : > { %v1119_v22 = vpop.f32.mrf.mxu1 }
  0xf2   : > { %v1165_v23 = vpop.f32.mrf.mxu2  ;;  %v1212_v24 = vpop.f32.mrf.mxu3  ;;  %v1120_v54 = vadd.f32 %v1119_v22, %v1082_v20 }
  0xf3   : > { %v1224_v39 = vadd.f32 %v1212_v24, %v1171_v35  ;;  %v1173_v40 = vadd.f32 %v1165_v23, %v1117_v38 }
  0xf5   : > { %v1268_v30 = vpop.f32.mrf.mxu0  ;;  %v1277_v46 = vadd.f32 %v1265_v25, %v1224_v39 }
  0xf9   : > { %v1317_v26 = vpop.f32.mrf.mxu1 }
  0xfa   : > { %v1168_v27 = vpop.f32.mrf.mxu2  ;;  %v1215_v28 = vpop.f32.mrf.mxu3  ;;  %v1329_v51 = vadd.f32 %v1317_v26, %v1277_v46 }
  0xfb   : > { %v1225_v36 = vadd.f32 %v1215_v28, %v1172_v34  ;;  %v1174_v59 = vadd.f32 %v1168_v27, %v1120_v54  ;;  %v3088_v54 = vld [vmem:[%s4363_s29] ss:$0 sm:$0xff]  ;;  %s1011_s29 = scalar_lea.vmem %s4323_s28, %s4369_s2 }
  0xfd   : > { %v1278_v41 = vadd.f32 %v1268_v30, %v1225_v36  ;;  %v1271_v44 = vpop.f32.mrf.mxu0 }
 0x101   : > { %v1320_v32 = vpop.f32.mrf.mxu1 }
 0x102   : > { %v1370_v33 = vpop.f32.mrf.mxu2  ;;  %v1218_v37 = vpop.f32.mrf.mxu3  ;;  %v1330_v47 = vadd.f32 %v1320_v32, %v1278_v41 }
 0x103   : > { %v1226_v48 = vadd.f32 %v1218_v37, %v1173_v40  ;;  %v1382_v55 = vadd.f32 %v1370_v33, %v1329_v51  ;;  %v1423_v37 = vmul.f32 %v3097_v13, %v1422_v31 }
 0x105   : > { %v1279_v57 = vadd.f32 %v1271_v44, %v1226_v48  ;;  %v1390_v63 = vadd.f32 %v3087_v56, %v1382_v55  ;;  %v1274_v2 = vpop.f32.mrf.mxu0  ;;  %v1424_v42 = vadd.f32 %v3097_v13, %v1423_v37  ;;  %v2893_v37 = vld [vmem:[%s4364_s30 + $0x20] sm:$0xff] }
 0x107   : > { %v1398_v7 = vmul.f32 0.01, %v1390_v63  ;;  %vm1394_vm8 = vcmp.ge.f32.partialorder %v1390_v63, 0.0 }
 0x109   : > { %v1323_v50 = vpop.f32.mrf.mxu1  ;;  %v3924_v14 = vsel %vm1394_vm8, %v1390_v63, %v1398_v7 }
 0x10a   : > { %v1373_v45 = vpop.f32.mrf.mxu2  ;;  %v1221_v58 = vpop.f32.mrf.mxu3  ;;  %v1331_v60 = vadd.f32 %v1323_v50, %v1279_v57  ;;  %v1407_v19 = vsel %vm1406_vm10, %v3924_v14, 0.0  ;;  %v1428_v25 = vsel %vm1406_vm10, %v3924_v14, -inf }
 0x10b   : > { %v1383_v52 = vadd.f32 %v1373_v45, %v1330_v47  ;;  %v1227_v0 = vadd.f32 %v1221_v58, %v1174_v59  ;;  %v3946_v47 = vsel %vm1425_vm12, %v3097_v13, %v1424_v42  ;;  %v3089_v59 = vld [vmem:[#allocation5] ss:$0 sm:$0xff] }
 0x10d   : > { %v1391_v61 = vadd.f32 %v3087_v56, %v1383_v52  ;;  %v1280_v8 = vadd.f32 %v1274_v2, %v1227_v0 }
 0x10f   : > { %v1399_v3 = vmul.f32 0.01, %v1391_v61  ;;  %vm1395_vm7 = vcmp.ge.f32.partialorder %v1391_v61, 0.0 }
 0x111   : > { %v1326_v6 = vpop.f32.mrf.mxu1  ;;  %v3922_v10 = vsel %vm1395_vm7, %v1391_v61, %v1399_v3 }
 0x112   : > { %v1376_v62 = vpop.f32.mrf.mxu2  ;;  %v1332_v11 = vadd.f32 %v1326_v6, %v1280_v8  ;;  %v1408_v17 = vsel %vm1406_vm10, %v3922_v10, 0.0  ;;  %v1429_v24 = vsel %vm1406_vm10, %v3922_v10, -inf }
 0x113   : > { %v1384_v1 = vadd.f32 %v1376_v62, %v1331_v60  ;;  %v1409_v22 = vadd.f32 %v1408_v17, %v1407_v19  ;;  %v1432_v32 = vmax.f32 %v1428_v25, %v1429_v24 }
 0x115   : > { %v1392_v4 = vadd.f32 %v3087_v56, %v1384_v1 }
 0x117   : > { %v1400_v9 = vmul.f32 0.01, %v1392_v4  ;;  %vm1396_vm9 = vcmp.ge.f32.partialorder %v1392_v4, 0.0 }
 0x119   : > { %v3926_v15 = vsel %vm1396_vm9, %v1392_v4, %v1400_v9 }
 0x11a   : > { %v1379_v12 = vpop.f32.mrf.mxu2  ;;  %v1410_v20 = vsel %vm1406_vm10, %v3926_v15, 0.0  ;;  %v1430_v28 = vsel %vm1406_vm10, %v3926_v15, -inf }
 0x11b   : > { %v1385_v16 = vadd.f32 %v1379_v12, %v1332_v11  ;;  %v1411_v26 = vadd.f32 %v1410_v20, %v1409_v22 }
 0x11d   : > { %v1393_v18 = vadd.f32 %v3087_v56, %v1385_v16 }
 0x11f   : > { %vm1397_vm11 = vcmp.ge.f32.partialorder %v1393_v18, 0.0  ;;  %v1401_v23 = vmul.f32 0.01, %v1393_v18 }
 0x121   : > { %v3938_v27 = vsel %vm1397_vm11, %v1393_v18, %v1401_v23 }
 0x122   : > { %v1412_v29 = vsel %vm1406_vm10, %v3938_v27, 0.0  ;;  %v1431_v30 = vsel %vm1406_vm10, %v3938_v27, -inf }
 0x123   : > { %v1413_v33 = vadd.f32 %v1412_v29, %v1411_v26  ;;  %v1433_v34 = vmax.f32 %v1430_v28, %v1431_v30 }
 0x125   : > { %v1414_v35 = vrot.slane %v1413_v33, 4  ;;  %v1434_v36 = vmax.f32 %v1432_v32, %v1433_v34 }
 0x127   : > { %v1415_v38 = vadd.f32 %v1414_v35, %v1413_v33  ;;  %v1435_v39 = vrot.slane %v1434_v36, 4 }
 0x129   : > { %v1416_v40 = vrot.slane %v1415_v38, 2  ;;  %v1436_v41 = vmax.f32 %v1434_v36, %v1435_v39 }
 0x12b   : > { %v1417_v43 = vadd.f32 %v1416_v40, %v1415_v38  ;;  %v1437_v44 = vrot.slane %v1436_v41, 2 }
 0x12d   : > { %v1418_v45 = vrot.slane %v1417_v43, 1  ;;  %v1438_v46 = vmax.f32 %v1436_v41, %v1437_v44  ;;  %v2894_v44 = vld [vmem:[%s4364_s30 + $0x28] sm:$0xff] }
 0x12f   : > { %v1419_v48 = vadd.f32 %v1418_v45, %v1417_v43  ;;  %v1439_v49 = vrot.slane %v1438_v46, 1  ;;  %v1568_v43 = vld [vmem:[%s4364_s30] sm:$0xff]  ;;  %v1569_v45 = vld [vmem:[%s4364_s30 + $0x8] sm:$0xff] }
 0x131   : > { %v1427_v50 = vmul.f32 %v3946_v47, %v1419_v48  ;;  %v1440_v51 = vmax.f32 %v1438_v46, %v1439_v49  ;;  %v2895_v46 = vld [vmem:[%s4364_s30 + $0x30] sm:$0xff]  ;;  %v2896_v48 = vld [vmem:[%s4364_s30 + $0x38] sm:$0xff] }
 0x132   : > { %v1571_v49 = vld [vmem:[%s4364_s30 + $0x18] sm:$0xff] }
 0x133   : > { %v1442_v52 = vsel %vm1441_vm13, %v1427_v50, %v1440_v51 }
 0x134   : > { %2889 = vmatmul.msk.f32.vlgmr.msra.gmra.mxu3 %vm1406_vm10, %v1442_v52 }
 0x1b7   : > { %v1471_v55 = vpop.f32.mrf.mxu3 }
 0x1b8   : > { %v1472_v56 = vadd.f32 %v3088_v54, %v1471_v55  ;;  %v3090_v54 = vld [vmem:[#allocation2] ss:$0 sm:$0xff] }
 0x1ba   : > { %vm1474_vm14 = vcmp.ge.f32.partialorder %v1472_v56, 0.0  ;;  %v1475_v57 = vmul.f32 0.01, %v1472_v56 }
 0x1bc   : > { %v1476_v58 = vsel %vm1474_vm14, %v1472_v56, %v1475_v57  ;;  %v3510_v56 = vmov 0  }
 0x1bd   : > { %2891 = vmatmul.msk.f32.vlgmr.msrb.gmra.mxu3 %vm1482_vm15, %v1476_v58  ;;  %3085 = vset.pattern.permute.xlu1 %v3510_v56 }
 0x1be   : > { %3084 = vset.pattern.permute.xlu0 %v3510_v56  ;;  %3086 = vset.pattern.permute.xlu2 %v3510_v56 }
 0x240   : > { %v1506_v60 = vpop.f32.mrf.mxu3 }
 0x241   : > { %v1507_v61 = vadd.f32 %v3089_v59, %v1506_v60 }
 0x243   : > { %v1510_v62 = vsel %vm1509_vm0, %v1507_v61, 0.0 }
 0x244   : > { %v1511_v63 = vrot.slane %v1510_v62, 4 }
 0x246   : > { %v1512_v0 = vadd.f32 %v1511_v63, %v1510_v62 }
 0x248   : > { %v1513_v1 = vrot.slane %v1512_v0, 2 }
 0x24a   : > { %v1514_v2 = vadd.f32 %v1513_v1, %v1512_v0 }
 0x24c   : > { %v1515_v3 = vrot.slane %v1514_v2, 1 }
 0x24e   : > { %v1516_v4 = vadd.f32 %v1515_v3, %v1514_v2 }
 0x250   : > { %v2892_v5 = vmul.f32 -1.442695, %v1516_v4 }
 0x252   : > { %3098 = vpow2.f32 %v2892_v5 }
 0x258   : > { %v3099_v6 = vpop.eup %3098 }
 0x259   : > { %v1520_v7 = vadd.f32 1.0, %v3099_v6 }
 0x25b   : > { %3100 = vrcp.f32 %v1520_v7  ;;  %v1532_v12 = vand.u32 2147483648, %v1520_v7  ;;  %v1530_v16 = vand.u32 2147483647, %v1520_v7  ;;  %vm1526_vm8 = vweird.f32 %v1520_v7 }
 0x25d   : > { %v1533_v18 = vor.u32 1.1754944e-38, %v1532_v12  ;;  %vm1531_vm11 = vcmp.eq.f32.partialorder %v1530_v16, 8.507059e+37 }
 0x261   : > { %v3101_v8 = vpop.eup %3100 }
 0x262   : > { %v1522_v9 = vmul.f32 %v3101_v8, %v1520_v7  ;;  %vm1527_vm7 = vweird.f32 %v3101_v8 }
 0x263   : > { %vm1528_vm9 = vmor %vm1526_vm8, %vm1527_vm7 }
 0x264   : > { %v1523_v11 = vsub.f32 1.0, %v1522_v9 }
 0x266   : > { %v1524_v13 = vmul.f32 %v3101_v8, %v1523_v11 }
 0x268   : > { %v1525_v17 = vadd.f32 %v3101_v8, %v1524_v13 }
 0x26a   : > { %v1529_v19 = vsel %vm1528_vm9, %v3101_v8, %v1525_v17 }
 0x26b   : > { %v1534_v20 = vsel %vm1531_vm11, %v1533_v18, %v1529_v19 }
 0x26c   : > { %v3959_v21 = vmul.f32 %v1534_v20, %v3938_v27  ;;  %v3962_v22 = vmul.f32 %v1534_v20, %v3926_v15  ;;  %v3971_v26 = vmul.f32 %v1534_v20, %v3922_v10  ;;  %v3974_v27 = vmul.f32 %v1534_v20, %v3924_v14 }
 0x26e   : > { %v1565_v23 = vsel %vm1406_vm10, %v3959_v21, -inf  ;;  %v1549_v24 = vsel %vm1406_vm10, %v3959_v21, 0.0  ;;  %v1546_v25 = vsel %vm1406_vm10, %v3962_v22, 0.0  ;;  %v1562_v15 = vsel %vm1406_vm10, %v3962_v22, -inf }
 0x26f   : > { %1566 = vmax.xlane.f32.xlu0 %v1565_v23  ;;  %1550 = vadd.xlane.f32.xlu1 %v1549_v24  ;;  %v1559_v28 = vsel %vm1406_vm10, %v3971_v26, -inf  ;;  %v1556_v29 = vsel %vm1406_vm10, %v3974_v27, -inf  ;;  %v1543_v30 = vsel %vm1406_vm10, %v3971_v26, 0.0  ;;  %v1540_v10 = vsel %vm1406_vm10, %v3974_v27, 0.0 }
 0x270   : > { %1547 = vadd.xlane.f32.xlu2 %v1546_v25 }
 0x277   : > { %1563 = vmax.xlane.f32.xlu0 %v1562_v15  ;;  %1560 = vmax.xlane.f32.xlu1 %v1559_v28 }
 0x278   : > { %1557 = vmax.xlane.f32.xlu2 %v1556_v29 }
 0x27f   : > { %1544 = vadd.xlane.f32.xlu0 %v1543_v30  ;;  %1541 = vadd.xlane.f32.xlu1 %v1540_v10 }
 0x2e2   : > { %v1567_v14 = vpop.xlane.xlu0 %1566  ;;  %v1551_v31 = vpop.xlane.xlu1 %1550 }
 0x2e3   : > { %v1555_v32 = vmul.f32 %v1551_v31, %v3946_v47  ;;  %v1548_v33 = vpop.xlane.xlu2 %1547  ;;  %1601 = vmatpush.msra.mxu3 %v1567_v14 }
 0x2e4   : > { %v1554_v34 = vmul.f32 %v1548_v33, %v3946_v47 }
 0x2e5   : > { %1642 = vmatpush.msra.mxu0 %v1555_v32 }
 0x2e7   : > { %1643 = vmatpush.msra.mxu0 %v1554_v34 }
 0x2ea   : > { %v1564_v35 = vpop.xlane.xlu0 %1563  ;;  %v1561_v36 = vpop.xlane.xlu1 %1560 }
 0x2eb   : > { %1602 = vmatpush.msra.mxu3 %v1564_v35  ;;  %v1558_v38 = vpop.xlane.xlu2 %1557 }
 0x2ed   : > { %1603 = vmatpush.msra.mxu3 %v1561_v36 }
 0x2ef   : > { %1604 = vmatpush.msra.mxu3 %v1558_v38 }
 0x2f0   : > { %2897 = vmatmul.msk.f32.vlgmr.msra.gmra.mxu3 %vm1406_vm10, %v2893_v37 }
 0x2f2   : > { %v1545_v39 = vpop.xlane.xlu0 %1544  ;;  %v1542_v40 = vpop.xlane.xlu1 %1541 }
 0x2f3   : > { %v1553_v41 = vmul.f32 %v1545_v39, %v3946_v47  ;;  %v1552_v42 = vmul.f32 %v1542_v40, %v3946_v47  ;;  %v1570_v47 = vld [vmem:[%s4364_s30 + $0x10] sm:$0xff] }
 0x2f5   : > { %1644 = vmatpush.msra.mxu0 %v1553_v41 }
 0x2f7   : > { %1645 = vmatpush.msra.mxu0 %v1552_v42 }
 0x2f8   : > { %2901 = vmatmul.msk.f32.vlgmr.msra.gmra.mxu0 %vm1406_vm10, %v1568_v43  ;;  %2898 = vmatmul.msk.f32.gmra.mxu3 %vm1406_vm10, %v2894_v44 }
 0x300   : > { %2902 = vmatmul.msk.f32.gmra.mxu0 %vm1406_vm10, %v1569_v45  ;;  %2899 = vmatmul.msk.f32.gmra.mxu3 %vm1406_vm10, %v2895_v46 }
 0x308   : > { %2903 = vmatmul.msk.f32.gmra.mxu0 %vm1406_vm10, %v1570_v47  ;;  %2900 = vmatmul.msk.f32.gmra.mxu3 %vm1406_vm10, %v2896_v48 }
 0x310   : > { %2904 = vmatmul.msk.f32.gmra.mxu0 %vm1406_vm10, %v1571_v49 }
 0x373   : > { %v1606_v50 = vpop.f32.mrf.mxu3 }
 0x375   : > { %v1647_v51 = vpop.f32.mrf.mxu0 }
 0x376   : > { %v1648_v57 = vadd.f32 %v1647_v51, %v1606_v50 }
 0x378   : > { %v1663_v60 = vadd.f32 %v3090_v54, %v1648_v57 }
 0x37a   : > { %v2905_v0 = vmul.f32 -1.442695, %v1663_v60 }
 0x37b   : > { %v1609_v52 = vpop.f32.mrf.mxu3 }
 0x37d   : > { %v1650_v53 = vpop.f32.mrf.mxu0 }
 0x37e   : > { %v1651_v55 = vadd.f32 %v1650_v53, %v1609_v52 }
 0x380   : > { %v1664_v58 = vadd.f32 %v3090_v54, %v1651_v55 }
 0x382   : > { %v2906_v59 = vmul.f32 -1.442695, %v1664_v58 }
 0x383   : > { %v1612_v61 = vpop.f32.mrf.mxu3 }
 0x384   : > { %3102 = vpow2.f32 %v2906_v59 }
 0x385   : > { %v1653_v62 = vpop.f32.mrf.mxu0  ;;  %3104 = vpow2.f32 %v2905_v0 }
 0x386   : > { %v1654_v63 = vadd.f32 %v1653_v62, %v1612_v61 }
 0x388   : > { %v1665_v1 = vadd.f32 %v3090_v54, %v1654_v63 }
 0x38a   : > { %v3103_v2 = vpop.eup %3102  ;;  %v2907_v3 = vmul.f32 -1.442695, %v1665_v1 }
 0x38b   : > { %v1680_v4 = vadd.f32 1.0, %v3103_v2  ;;  %v1615_v5 = vpop.f32.mrf.mxu3  ;;  %v3105_v9 = vpop.eup %3104 }
 0x38c   : > { %3106 = vpow2.f32 %v2907_v3  ;;  %v4022_v17 = vadd.f32 1.0, %v3105_v9  ;;  %v1814_v9 = vld [vmem:[#allocation7 + $0x30] sm:$0xff] }
 0x38d   : > { %3108 = vrcp.f32 %v1680_v4  ;;  %v1656_v6 = vpop.f32.mrf.mxu0  ;;  %v1709_v20 = vand.u32 2147483648, %v1680_v4  ;;  %v1707_v24 = vand.u32 2147483647, %v1680_v4  ;;  %vm1703_vm14 = vweird.f32 %v1680_v4 }
 0x38e   : > { %v1657_v7 = vadd.f32 %v1656_v6, %v1615_v5  ;;  %v1694_v55 = vand.u32 2147483648, %v4022_v17  ;;  %v1692_v56 = vand.u32 2147483647, %v4022_v17  ;;  %v1810_v5 = vld [vmem:[#allocation7 + $0x18] sm:$0xff] }
 0x38f   : > { %v1710_v30 = vor.u32 1.1754944e-38, %v1709_v20  ;;  %vm1708_vm0 = vcmp.eq.f32.partialorder %v1707_v24, 8.507059e+37  ;;  %v1815_v6 = vld [vmem:[#allocation7 + $0x38] sm:$0xff]  ;;  %v1956_v20 = vld [vmem:[#allocation7 + $0x80] sm:$0xff]  ;;  %v1880_v24 = vld [vmem:[#allocation7 + $0x50] sm:$0xff] }
 0x390   : > { %v1666_v8 = vadd.f32 %v3090_v54, %v1657_v7  ;;  %v1695_v58 = vor.u32 1.1754944e-38, %v1694_v55  ;;  %1839 = vmatpush.msra.mxu2 %v1815_v6  ;;  %v1920_v7 = vld [vmem:[#allocation7 + $0x78] sm:$0xff]  ;;  %v2040_v55 = vld [vmem:[%s4366_s15 + $0x30] sm:$0xff] }
 0x391   : > { %1942 = vmatpush.msrb.mxu3 %v1920_v7 }
 0x392   : > { %v3107_v11 = vpop.eup %3106  ;;  %v2908_v12 = vmul.f32 -1.442695, %v1666_v8  ;;  %v1959_v8 = vld [vmem:[#allocation7 + $0x98] sm:$0xff]  ;;  %1840 = vmatpush.msra.mxu2 %v1814_v9 }
 0x393   : > { %v3109_v13 = vpop.eup %3108  ;;  %v1681_v16 = vadd.f32 1.0, %v3107_v11  ;;  %1981 = vmatpush.msrb.mxu0 %v1959_v8  ;;  %v1919_v11 = vld [vmem:[#allocation7 + $0x70] sm:$0xff] }
 0x394   : > { %3110 = vpow2.f32 %v2908_v12  ;;  %v1699_v18 = vmul.f32 %v3109_v13, %v1680_v4  ;;  %vm1704_vm12 = vweird.f32 %v3109_v13  ;;  %v1767_v4 = vld [vmem:[%s4365_s6] sm:$0xff]  ;;  %v1958_v12 = vld [vmem:[#allocation7 + $0x90] sm:$0xff]  ;;  %1943 = vmatpush.msrb.mxu3 %v1919_v11 }
 0x395   : > { %3112 = vrcp.f32 %v1681_v16  ;;  %vm1705_vm15 = vmor %vm1703_vm14, %vm1704_vm12  ;;  %v1724_v34 = vand.u32 2147483648, %v1681_v16  ;;  %v1722_v36 = vand.u32 2147483647, %v1681_v16  ;;  %vm1718_vm8 = vweird.f32 %v1681_v16  ;;  %1982 = vmatpush.msrb.mxu0 %v1958_v12 }
 0x396   : > { %v1700_v19 = vsub.f32 1.0, %v1699_v18  ;;  %3114 = vrcp.f32 %v4022_v17  ;;  %v1812_v18 = vld [vmem:[#allocation7 + $0x20] sm:$0xff] }
 0x397   : > { %v1725_v40 = vor.u32 1.1754944e-38, %v1724_v34  ;;  %vm1723_vm11 = vcmp.eq.f32.partialorder %v1722_v36, 8.507059e+37 }
 0x398   : > { %v1701_v23 = vmul.f32 %v3109_v13, %v1700_v19  ;;  %v1917_v19 = vld [vmem:[#allocation7 + $0x60] sm:$0xff] }
 0x39a   : > { %v3111_v25 = vpop.eup %3110  ;;  %v1702_v15 = vadd.f32 %v3109_v13, %v1701_v23  ;;  %v1881_v23 = vld [vmem:[#allocation7 + $0x58] sm:$0xff] }
 0x39b   : > { %v3113_v28 = vpop.eup %3112  ;;  %v1682_v29 = vadd.f32 1.0, %v3111_v25  ;;  %v1879_v25 = vld [vmem:[#allocation7 + $0x48] sm:$0xff] }
 0x39c   : > { %v1706_v10 = vsel %vm1705_vm15, %v3109_v13, %v1702_v15  ;;  %v1714_v14 = vmul.f32 %v3113_v28, %v1681_v16  ;;  %v3115_v32 = vpop.eup %3114  ;;  %vm1719_vm7 = vweird.f32 %v3113_v28  ;;  %v1813_v13 = vld [vmem:[#allocation7 + $0x28] sm:$0xff]  ;;  %v1878_v15 = vld [vmem:[#allocation7 + $0x40] sm:$0xff] }
 0x39d   : > { %3116 = vrcp.f32 %v1682_v29  ;;  %v1711_v31 = vsel %vm1708_vm0, %v1710_v30, %v1706_v10  ;;  %v1684_v37 = vmul.f32 %v3115_v32, %v4022_v17  ;;  %vm1720_vm9 = vmor %vm1718_vm8, %vm1719_vm7  ;;  %v1739_v44 = vand.u32 2147483648, %v1682_v29  ;;  %v1918_v16 = vld [vmem:[#allocation7 + $0x68] sm:$0xff]  ;;  %1841 = vmatpush.msra.mxu2 %v1813_v13 }
 0x39e   : > { %1750 = vperm.xlu1 %3085, %v1711_v31   ;;  %v1715_v33 = vsub.f32 1.0, %v1714_v14  ;;  %vm1733_vm12 = vweird.f32 %v1682_v29  ;;  %v1737_v47 = vand.u32 2147483647, %v1682_v29  ;;  %vm1689_vm7 = vweird.f32 %v3115_v32  ;;  %1944 = vmatpush.msrb.mxu3 %v1918_v16 }
 0x39f   : > { %v1685_v45 = vsub.f32 1.0, %v1684_v37  ;;  %v1740_v49 = vor.u32 1.1754944e-38, %v1739_v44  ;;  %vm1688_vm8 = vweird.f32 %v4022_v17  ;;  %v1957_v17 = vld [vmem:[#allocation7 + $0x88] sm:$0xff]  ;;  %1842 = vmatpush.msra.mxu2 %v1812_v18 }
 0x3a0   : > { %v1716_v35 = vmul.f32 %v3113_v28, %v1715_v33  ;;  %vm1738_vm0 = vcmp.eq.f32.partialorder %v1737_v47, 8.507059e+37  ;;  %1983 = vmatpush.msrb.mxu0 %v1957_v17  ;;  %1945 = vmatpush.msrb.mxu3 %v1917_v19 }
 0x3a1   : > { %v1686_v51 = vmul.f32 %v3115_v32, %v1685_v45  ;;  %1903 = vmatpush.msrb.mxu2 %v1881_v23 }
 0x3a2   : > { %v1717_v38 = vadd.f32 %v3113_v28, %v1716_v35  ;;  %1984 = vmatpush.msrb.mxu0 %v1956_v20 }
 0x3a3   : > { %v3117_v39 = vpop.eup %3116  ;;  %v1687_v54 = vadd.f32 %v3115_v32, %v1686_v51  ;;  %1904 = vmatpush.msrb.mxu2 %v1880_v24 }
 0x3a4   : > { %v1721_v41 = vsel %vm1720_vm9, %v3113_v28, %v1717_v38  ;;  %v1729_v42 = vmul.f32 %v3117_v39, %v1682_v29  ;;  %vm1734_vm14 = vweird.f32 %v3117_v39  ;;  %vm1690_vm9 = vmor %vm1688_vm8, %vm1689_vm7 }
 0x3a5   : > { %v1726_v43 = vsel %vm1723_vm11, %v1725_v40, %v1721_v41  ;;  %vm1735_vm15 = vmor %vm1733_vm12, %vm1734_vm14  ;;  %v1691_v57 = vsel %vm1690_vm9, %v3115_v32, %v1687_v54  ;;  %vm1693_vm11 = vcmp.eq.f32.partialorder %v1692_v56, 8.507059e+37  ;;  %1905 = vmatpush.msrb.mxu2 %v1879_v25  ;;  %v2041_v54 = vld [vmem:[%s4366_s15 + $0x38] sm:$0xff] }
 0x3a6   : > { %1755 = vperm.xlu0 %3084, %v1726_v43   ;;  %v1730_v46 = vsub.f32 1.0, %v1729_v42  ;;  %v1696_v59 = vsel %vm1693_vm11, %v1695_v58, %v1691_v57  ;;  %v2039_v57 = vld [vmem:[%s4366_s15 + $0x28] sm:$0xff]  ;;  %v2038_v58 = vld [vmem:[%s4366_s15 + $0x20] sm:$0xff] }
 0x3a7   : > { %1906 = vmatpush.msrb.mxu2 %v1878_v15 }
 0x3a8   : > { %v1731_v48 = vmul.f32 %v3117_v39, %v1730_v46 }
 0x3aa   : > { %v1732_v50 = vadd.f32 %v3117_v39, %v1731_v48 }
 0x3ac   : > { %v1736_v52 = vsel %vm1735_vm15, %v3117_v39, %v1732_v50  ;;  %vm2077_vm15 = vcmask 31744  }
 0x3ad   : > { %v1741_v53 = vsel %vm1738_vm0, %v1740_v49, %v1736_v52  ;;  %vm2104_vm0 = vcmask 517120  }
 0x3ae   : > { %1760 = vperm.xlu2 %3086, %v1741_v53  }
 0x3b6   : > { %1745 = vperm.xlu2 %3086, %v1696_v59  }
 0x408   : > { %v1761_v60 = vpop.permute.xlu2 %1760 }
 0x409   : > { %v1766_v61 = vmul.f32 %v1761_v60, %v3959_v21  ;;  %v1809_v21 = vld [vmem:[#allocation7 + $0x10] sm:$0xff] }
 0x40a   : > { %v2037_v60 = vld [vmem:[%s4366_s15 + $0x18] sm:$0xff] }
 0x40b   : > { %1787 = vmatpush.msra.mxu1 %v1766_v61 }
 0x410   : > { %v1751_v62 = vpop.permute.xlu1 %1750  ;;  %v1746_v1 = vpop.permute.xlu2 %1745 }
 0x411   : > { %v1764_v2 = vmul.f32 %v1751_v62, %v3971_v26  ;;  %v1763_v3 = vmul.f32 %v1746_v1, %v3974_v27  ;;  %v1808_v26 = vld [vmem:[#allocation7 + $0x8] sm:$0xff]  ;;  %v1807_v27 = vld [vmem:[#allocation7] sm:$0xff] }
 0x412   : > { %v2036_v62 = vld [vmem:[%s4366_s15 + $0x10] sm:$0xff] }
 0x418   : > { %v1756_v63 = vpop.permute.xlu0 %1755 }
 0x419   : > { %v1765_v0 = vmul.f32 %v1756_v63, %v3962_v22  ;;  %v1768_v22 = vld [vmem:[%s4365_s6 + $0x8] sm:$0xff] }
 0x41b   : > { %1788 = vmatpush.msra.mxu1 %v1765_v0 }
 0x41d   : > { %1789 = vmatpush.msra.mxu1 %v1764_v2  ;;  %v2035_v2 = vld [vmem:[%s4366_s15 + $0x8] sm:$0xff] }
 0x41f   : > { %1790 = vmatpush.msra.mxu1 %v1763_v3 }
 0x420   : > { %2909 = vmatmul.msk.f32.vlgmr.msra.gmra.mxu1 %vm1406_vm10, %v1767_v4 }
 0x421   : > { %1866 = vmatpush.msrb.mxu1 %v1810_v5  ;;  %v2034_v5 = vld [vmem:[%s4366_s15] sm:$0xff] }
 0x423   : > { %1867 = vmatpush.msrb.mxu1 %v1809_v21 }
 0x425   : > { %1868 = vmatpush.msrb.mxu1 %v1808_v26 }
 0x427   : > { %1869 = vmatpush.msrb.mxu1 %v1807_v27  ;;  %v3511_v27 = vmov 16.0  }
 0x428   : > { %2910 = vmatmul.msk.f32.gmra.mxu1 %vm1406_vm10, %v1768_v22  ;;  %v3091_v22 = vld [vmem:[#allocation9] ss:$0 sm:$0xff]  ;;  %3118 = vrcp.f32 %v3511_v27 }
 0x429   : > { %2057 = vmatpush.msra.mxu1 %v2041_v54 }
 0x42b   : > { %2058 = vmatpush.msra.mxu1 %v2040_v55  ;;  %v3093_v55 = vld [vmem:[#allocation13] ss:$0 sm:$0xff] }
 0x42d   : > { %2059 = vmatpush.msra.mxu1 %v2039_v57 }
 0x42e   : > { %v3119_v13 = vpop.eup %3118 }
 0x42f   : > { %2060 = vmatpush.msra.mxu1 %v2038_v58  ;;  %v2017_v20 = vmul.f32 16.0, %v3119_v13  ;;  %vm2021_vm12 = vweird.f32 %v3119_v13 }
 0x431   : > { %2061 = vmatpush.msra.mxu1 %v2037_v60  ;;  %v2018_v15 = vsub.f32 1.0, %v2017_v20 }
 0x433   : > { %2062 = vmatpush.msra.mxu1 %v2036_v62 }
 0x435   : > { %2063 = vmatpush.msra.mxu1 %v2035_v2 }
 0x437   : > { %2064 = vmatpush.msra.mxu1 %v2034_v5 }
 0x49d   : > { %v1792_v28 = vpop.f32.mrf.mxu1 }
 0x49e   : > { %v1800_v29 = vrot.slane %v1792_v28, 6 }
 0x4a0   : > { %v1805_v30 = vsel %vm1335_vm6, 0.0, %v1800_v29 }
 0x4a1   : > { %2913 = vmatmul.msk.f32.vlgmr.msrb.gmra.mxu1 %vm1406_vm10, %v1805_v30  ;;  %v1818_v31 = vrot.slane %v1805_v30, 1  ;;  %v1921_v32 = vrot.slane %v1805_v30, 3  ;;  %v1960_v34 = vrot.slane %v1805_v30, 4  ;;  %v1882_v49 = vrot.slane %v1805_v30, 2 }
 0x4a5   : > { %v1795_v10 = vpop.f32.mrf.mxu1 }
 0x4a6   : > { %v1801_v14 = vrot.slane %v1795_v10, 6 }
 0x4a8   : > { %v1802_v33 = vsel %vm1335_vm6, %v1800_v29, %v1801_v14  ;;  %v1806_v41 = vsel %vm1335_vm6, %v1801_v14, 0.0  ;;  %vm2006_vm6 = vcmask 523264  }
 0x4a9   : > { %2914 = vmatmul.msk.f32.gmra.mxu1 %vm1406_vm10, %v1802_v33  ;;  %v1819_v35 = vrot.slane %v1802_v33, 1  ;;  %v1922_v36 = vrot.slane %v1802_v33, 3  ;;  %v1961_v37 = vrot.slane %v1802_v33, 4  ;;  %v1821_v42 = vrot.slane %v1806_v41, 1 }
 0x4aa   : > { %v1924_v43 = vrot.slane %v1806_v41, 3  ;;  %v1963_v44 = vrot.slane %v1806_v41, 4  ;;  %v1883_v48 = vrot.slane %v1802_v33, 2  ;;  %v1885_v51 = vrot.slane %v1806_v41, 2 }
 0x4ab   : > { %v1820_v38 = vsel %vm1037_vm2, %v1818_v31, %v1819_v35  ;;  %v1923_v39 = vsel %vm1177_vm4, %v1921_v32, %v1922_v36  ;;  %v1962_v40 = vsel %vm1230_vm5, %v1960_v34, %v1961_v37  ;;  %v1822_v45 = vsel %vm1037_vm2, %v1819_v35, %v1821_v42 }
 0x4ac   : > { %2911 = vmatmul.msk.f32.vlgmr.msra.gmra.mxu2 %vm1406_vm10, %v1820_v38  ;;  %2917 = vmatmul.msk.f32.vlgmr.msrb.gmra.mxu3 %vm1406_vm10, %v1923_v39  ;;  %v1925_v46 = vsel %vm1177_vm4, %v1922_v36, %v1924_v43  ;;  %v1964_v47 = vsel %vm1230_vm5, %v1961_v37, %v1963_v44  ;;  %v1884_v50 = vsel %vm1124_vm3, %v1882_v49, %v1883_v48  ;;  %v2072_v49 = vld [vmem:[#allocation12] sm:$0xf] }
 0x4ad   : > { %2919 = vmatmul.msk.f32.vlgmr.msrb.gmra.mxu0 %vm1406_vm10, %v1962_v40  ;;  %v1886_v52 = vsel %vm1124_vm3, %v1883_v48, %v1885_v51  ;;  %v2019_v34 = vmul.f32 %v3119_v13, %v2018_v15  ;;  %2922 = vmatpush.msk.msra.mxu2 %vm1230_vm5, %v2072_v49 }
 0x4af   : > { %v2020_v39 = vadd.f32 %v3119_v13, %v2019_v34  ;;  %v2154_v34 = vld [vmem:[%s4313_s16] sm:$0xff] }
 0x4b1   : > { %v2022_v44 = vsel %vm2021_vm12, %v3119_v13, %v2020_v39 }
 0x4b4   : > { %2912 = vmatmul.msk.f32.gmra.mxu2 %vm1406_vm10, %v1822_v45  ;;  %2918 = vmatmul.msk.f32.gmra.mxu3 %vm1406_vm10, %v1925_v46 }
 0x4b5   : > { %2920 = vmatmul.msk.f32.gmra.mxu0 %vm1406_vm10, %v1964_v47 }
 0x4bc   : > { %2915 = vmatmul.msk.f32.vlgmr.msrb.gmra.mxu2 %vm1406_vm10, %v1884_v50  ;;  %v3092_v50 = vld [vmem:[#allocation10] ss:$0 sm:$0xff] }
 0x4c4   : > { %2916 = vmatmul.msk.f32.gmra.mxu2 %vm1406_vm10, %v1886_v52 }
 0x51e   : > { %v1871_v59 = vpop.f32.mrf.mxu1 }
 0x526   : > { %v1874_v26 = vpop.f32.mrf.mxu1 }
 0x52a   : > { %v1986_v3 = vpop.f32.mrf.mxu0 }
 0x52f   : > { %v1844_v53 = vpop.f32.mrf.mxu2  ;;  %v1947_v63 = vpop.f32.mrf.mxu3 }
 0x530   : > { %v1872_v61 = vadd.f32 %v1871_v59, %v1844_v53 }
 0x532   : > { %v1989_v16 = vpop.f32.mrf.mxu0 }
 0x537   : > { %v1847_v56 = vpop.f32.mrf.mxu2  ;;  %v1950_v11 = vpop.f32.mrf.mxu3 }
 0x538   : > { %v1875_v6 = vadd.f32 %v1874_v26, %v1847_v56 }
 0x53f   : > { %v1908_v0 = vpop.f32.mrf.mxu2 }
 0x540   : > { %v1914_v1 = vadd.f32 %v1908_v0, %v1872_v61 }
 0x542   : > { %v1953_v4 = vadd.f32 %v1947_v63, %v1914_v1 }
 0x544   : > { %v1992_v21 = vadd.f32 %v1986_v3, %v1953_v4 }
 0x546   : > { %v1998_v8 = vadd.f32 %v3091_v22, %v1992_v21 }
 0x547   : > { %v1911_v7 = vpop.f32.mrf.mxu2 }
 0x548   : > { %v1915_v9 = vadd.f32 %v1911_v7, %v1875_v6  ;;  %v2002_v17 = vmul.f32 0.01, %v1998_v8  ;;  %vm2000_vm4 = vcmp.ge.f32.partialorder %v1998_v8, 0.0 }
 0x54a   : > { %v1954_v12 = vadd.f32 %v1950_v11, %v1915_v9  ;;  %v4086_v23 = vsel %vm2000_vm4, %v1998_v8, %v2002_v17  ;;  %vm2159_vm4 = vcmask 130048  }
 0x54b   : > { %v2007_v28 = vsel %vm2006_vm6, %v4086_v23, 0.0  ;;  %v2024_v29 = vsel %vm2006_vm6, %v4086_v23, -inf }
 0x54c   : > { %v1993_v18 = vadd.f32 %v1989_v16, %v1954_v12 }
 0x54e   : > { %v1999_v19 = vadd.f32 %v3091_v22, %v1993_v18 }
 0x550   : > { %vm2001_vm10 = vcmp.ge.f32.partialorder %v1999_v19, 0.0  ;;  %v2003_v24 = vmul.f32 0.01, %v1999_v19 }
 0x552   : > { %v4088_v25 = vsel %vm2001_vm10, %v1999_v19, %v2003_v24  ;;  %v3512_v19 = vmov 64.0  }
 0x553   : > { %v2008_v30 = vsel %vm2006_vm6, %v4088_v25, 0.0  ;;  %v2025_v10 = vsel %vm2006_vm6, %v4088_v25, -inf }
 0x554   : > { %v2009_v14 = vadd.f32 %v2008_v30, %v2007_v28  ;;  %v2026_v31 = vmax.f32 %v2024_v29, %v2025_v10 }
 0x556   : > { %v2010_v32 = vrot.slane %v2009_v14, 4  ;;  %v2027_v33 = vrot.slane %v2026_v31, 4 }
 0x558   : > { %v2011_v35 = vadd.f32 %v2010_v32, %v2009_v14  ;;  %v2028_v36 = vmax.f32 %v2026_v31, %v2027_v33  ;;  %v2925_v14 = vld [vmem:[%s4313_s16 + $0x10] sm:$0xff] }
 0x55a   : > { %v2012_v37 = vrot.slane %v2011_v35, 2  ;;  %v2029_v38 = vrot.slane %v2028_v36, 2 }
 0x55c   : > { %v2013_v40 = vadd.f32 %v2012_v37, %v2011_v35  ;;  %v2030_v41 = vmax.f32 %v2028_v36, %v2029_v38  ;;  %v2926_v35 = vld [vmem:[%s4313_s16 + $0x18] sm:$0xff]  ;;  %v2155_v36 = vld [vmem:[%s4313_s16 + $0x8] sm:$0xff]  ;;  %v3094_v38 = vld [vmem:[#allocation3] ss:$0 sm:$0xff] }
 0x55e   : > { %v2014_v42 = vrot.slane %v2013_v40, 1  ;;  %v2031_v43 = vrot.slane %v2030_v41, 1 }
 0x560   : > { %v2015_v45 = vadd.f32 %v2014_v42, %v2013_v40  ;;  %v2032_v47 = vmax.f32 %v2030_v41, %v2031_v43 }
 0x562   : > { %v2023_v46 = vmul.f32 %v2022_v44, %v2015_v45 }
 0x564   : > { %v2033_v48 = vsel %vm1441_vm13, %v2023_v46, %v2032_v47 }
 0x565   : > { %2921 = vmatmul.msk.f32.vlgmr.msra.gmra.mxu1 %vm2006_vm6, %v2033_v48 }
 0x5e2   : > { %v2066_v51 = vpop.f32.mrf.mxu1 }
 0x5e3   : > { %v2067_v52 = vadd.f32 %v3092_v50, %v2066_v51 }
 0x5e5   : > { %vm2069_vm14 = vcmp.ge.f32.partialorder %v2067_v52, 0.0  ;;  %v2070_v53 = vmul.f32 0.01, %v2067_v52 }
 0x5e7   : > { %v2071_v54 = vsel %vm2069_vm14, %v2067_v52, %v2070_v53 }
 0x5e8   : > { %2923 = vmatmul.msk.f32.vlgmr.msra.gmra.mxu2 %vm2077_vm15, %v2071_v54 }
 0x66b   : > { %v2101_v56 = vpop.f32.mrf.mxu2 }
 0x66c   : > { %v2102_v57 = vadd.f32 %v3093_v55, %v2101_v56 }
 0x66e   : > { %v2105_v58 = vsel %vm2104_vm0, %v2102_v57, 0.0 }
 0x66f   : > { %v2106_v59 = vrot.slane %v2105_v58, 4 }
 0x671   : > { %v2107_v60 = vadd.f32 %v2106_v59, %v2105_v58 }
 0x673   : > { %v2108_v61 = vrot.slane %v2107_v60, 2 }
 0x675   : > { %v2109_v62 = vadd.f32 %v2108_v61, %v2107_v60 }
 0x677   : > { %v2110_v63 = vrot.slane %v2109_v62, 1 }
 0x679   : > { %v2111_v0 = vadd.f32 %v2110_v63, %v2109_v62 }
 0x67b   : > { %v2924_v1 = vmul.f32 -1.442695, %v2111_v0 }
 0x67d   : > { %3120 = vpow2.f32 %v2924_v1 }
 0x683   : > { %v3121_v2 = vpop.eup %3120 }
 0x684   : > { %v2115_v3 = vadd.f32 1.0, %v3121_v2 }
 0x686   : > { %3122 = vrcp.f32 %v2115_v3  ;;  %v2127_v22 = vand.u32 2147483648, %v2115_v3  ;;  %v2125_v27 = vand.u32 2147483647, %v2115_v3  ;;  %vm2121_vm7 = vweird.f32 %v2115_v3 }
 0x687   : > { %3124 = vrcp.f32 %v3512_v19  ;;  %v2305_v19 = vld [vmem:[%s4315_s19 + $0x10] sm:$0xff] }
 0x688   : > { %v2128_v7 = vor.u32 1.1754944e-38, %v2127_v22  ;;  %vm2126_vm9 = vcmp.eq.f32.partialorder %v2125_v27, 8.507059e+37  ;;  %v2309_v27 = vld [vmem:[%s4315_s19 + $0x30] sm:$0xff] }
 0x68c   : > { %v3123_v4 = vpop.eup %3122 }
 0x68d   : > { %v2117_v5 = vmul.f32 %v3123_v4, %v2115_v3  ;;  %vm2122_vm5 = vweird.f32 %v3123_v4  ;;  %v3125_v20 = vpop.eup %3124 }
 0x68e   : > { %vm2123_vm8 = vmor %vm2121_vm7, %vm2122_vm5  ;;  %vm2144_vm11 = vweird.f32 %v3125_v20 }
 0x68f   : > { %v2118_v21 = vsub.f32 1.0, %v2117_v5 }
 0x691   : > { %v2119_v26 = vmul.f32 %v3123_v4, %v2118_v21 }
 0x693   : > { %v2120_v6 = vadd.f32 %v3123_v4, %v2119_v26  ;;  %v2310_v26 = vld [vmem:[%s4315_s19 + $0x38] sm:$0xff] }
 0x695   : > { %v2124_v8 = vsel %vm2123_vm8, %v3123_v4, %v2120_v6  ;;  %v2941_v6 = vld [vmem:[%s4315_s19 + $0x78] sm:$0xff] }
 0x696   : > { %v2129_v9 = vsel %vm2126_vm9, %v2128_v7, %v2124_v8  ;;  %v2940_v7 = vld [vmem:[%s4315_s19 + $0x70] sm:$0xff]  ;;  %v2308_v8 = vld [vmem:[%s4315_s19 + $0x28] sm:$0xff]  ;;  %2335 = vmatpush.msra.mxu0 %v2941_v6 }
 0x697   : > { %v4102_v11 = vmul.f32 %v2129_v9, %v4088_v25  ;;  %v4105_v12 = vmul.f32 %v2129_v9, %v4086_v23  ;;  %v2140_v23 = vmul.f32 64.0, %v3125_v20  ;;  %v2951_v9 = vld [vmem:[%s4315_s19 + $0xb8] sm:$0xff]  ;;  %v2443_v6 = vld [vmem:[#allocation18 + $0x30] sm:$0xff] }
 0x698   : > { %2336 = vmatpush.msra.mxu0 %v2940_v7 }
 0x699   : > { %v2151_v13 = vsel %vm2006_vm6, %v4102_v11, -inf  ;;  %v2136_v16 = vsel %vm2006_vm6, %v4102_v11, 0.0  ;;  %v2148_v17 = vsel %vm2006_vm6, %v4105_v12, -inf  ;;  %v2133_v18 = vsel %vm2006_vm6, %v4105_v12, 0.0 }
 0x69a   : > { %2152 = vmax.xlane.f32.xlu2 %v2151_v13  ;;  %2137 = vadd.xlane.f32.xlu0 %v2136_v16  ;;  %v2141_v24 = vsub.f32 1.0, %v2140_v23  ;;  %v2939_v13 = vld [vmem:[%s4315_s19 + $0x68] sm:$0xff]  ;;  %v2950_v16 = vld [vmem:[%s4315_s19 + $0xb0] sm:$0xff] }
 0x69b   : > { %2149 = vmax.xlane.f32.xlu1 %v2148_v17  ;;  %v2307_v17 = vld [vmem:[%s4315_s19 + $0x20] sm:$0xff]  ;;  %2337 = vmatpush.msra.mxu0 %v2939_v13 }
 0x69c   : > { %v2142_v25 = vmul.f32 %v3125_v20, %v2141_v24  ;;  %v2521_v13 = vld [vmem:[#allocation18 + $0x128] sm:$0xff] }
 0x69e   : > { %v2143_v15 = vadd.f32 %v3125_v20, %v2142_v25 }
 0x6a0   : > { %v2145_v28 = vsel %vm2144_vm11, %v3125_v20, %v2143_v15  ;;  %v2274_v15 = vld [vmem:[%s4314_s18] sm:$0xff] }
 0x6a2   : > { %2134 = vadd.xlane.f32.xlu2 %v2133_v18  ;;  %v2306_v18 = vld [vmem:[%s4315_s19 + $0x18] sm:$0xff] }
 0x70d   : > { %v2153_v29 = vpop.xlane.xlu2 %2152  ;;  %v2138_v30 = vpop.xlane.xlu0 %2137 }
 0x70e   : > { %v2147_v10 = vmul.f32 %v2145_v28, %v2138_v30  ;;  %2180 = vmatpush.msra.mxu3 %v2153_v29  ;;  %v2150_v31 = vpop.xlane.xlu1 %2149  ;;  %v2938_v29 = vld [vmem:[%s4315_s19 + $0x60] sm:$0xff]  ;;  %v2947_v30 = vld [vmem:[%s4315_s19 + $0x98] sm:$0xff] }
 0x70f   : > { %2338 = vmatpush.msra.mxu0 %v2938_v29  ;;  %v2412_v29 = vld [vmem:[#allocation16] sm:$0xf] }
 0x710   : > { %2181 = vmatpush.msra.mxu3 %v2150_v31  ;;  %2209 = vmatpush.msrb.mxu1 %v2147_v10  ;;  %v2304_v10 = vld [vmem:[%s4315_s19 + $0x8] sm:$0xff]  ;;  %v2946_v31 = vld [vmem:[%s4315_s19 + $0x90] sm:$0xff] }
 0x711   : > { %2927 = vmatmul.msk.f32.vlgmr.msra.gmra.mxu3 %vm2159_vm4, %v2925_v14  ;;  %v2936_v14 = vld [vmem:[%s4315_s19 + $0x50] sm:$0xff] }
 0x712   : > { %2357 = vmatpush.msrb.mxu3 %v2310_v26  ;;  %v2522_v26 = vld [vmem:[#allocation18 + $0x130] sm:$0xff] }
 0x714   : > { %2358 = vmatpush.msrb.mxu3 %v2309_v27  ;;  %v2566_v27 = vld [vmem:[#allocation18 + $0x1d0] sm:$0xff] }
 0x715   : > { %v2135_v32 = vpop.xlane.xlu2 %2134 }
 0x716   : > { %v2146_v33 = vmul.f32 %v2145_v28, %v2135_v32  ;;  %2359 = vmatpush.msrb.mxu3 %v2308_v8  ;;  %v2949_v28 = vld [vmem:[%s4315_s19 + $0xa8] sm:$0xff]  ;;  %v2303_v32 = vld [vmem:[%s4315_s19] sm:$0xff] }
 0x717   : > { %v3095_v8 = vld [vmem:[#allocation15] ss:$0 sm:$0xff] }
 0x718   : > { %2210 = vmatpush.msrb.mxu1 %v2146_v33  ;;  %2360 = vmatpush.msrb.mxu3 %v2307_v17  ;;  %v2935_v33 = vld [vmem:[%s4315_s19 + $0x48] sm:$0xff]  ;;  %v2442_v17 = vld [vmem:[#allocation18 + $0x28] sm:$0xff] }
 0x719   : > { %2929 = vmatmul.msk.f32.vlgmr.msrb.gmra.mxu1 %vm2159_vm4, %v2154_v34  ;;  %2928 = vmatmul.msk.f32.gmra.mxu3 %vm2159_vm4, %v2926_v35  ;;  %v2934_v34 = vld [vmem:[%s4315_s19 + $0x40] sm:$0xff]  ;;  %v2945_v35 = vld [vmem:[%s4315_s19 + $0x88] sm:$0xff] }
 0x71a   : > { %2391 = vmatpush.msra.mxu1 %v2951_v9  ;;  %2361 = vmatpush.msrb.mxu3 %v2306_v18 }
 0x71c   : > { %2392 = vmatpush.msra.mxu1 %v2950_v16  ;;  %2362 = vmatpush.msrb.mxu3 %v2305_v19  ;;  %v2565_v16 = vld [vmem:[#allocation18 + $0x1c8] sm:$0xff]  ;;  %v2520_v19 = vld [vmem:[#allocation18 + $0x120] sm:$0xff] }
 0x71e   : > { %2393 = vmatpush.msra.mxu1 %v2949_v28  ;;  %2363 = vmatpush.msrb.mxu3 %v2304_v10  ;;  %v2488_v10 = vld [vmem:[#allocation18 + $0xe8] sm:$0xff] }
 0x720   : > { %2364 = vmatpush.msrb.mxu3 %v2303_v32  ;;  %v2485_v32 = vld [vmem:[#allocation18 + $0xd0] sm:$0xff] }
 0x721   : > { %2930 = vmatmul.msk.f32.gmra.mxu1 %vm2159_vm4, %v2155_v36  ;;  %v2944_v36 = vld [vmem:[%s4315_s19 + $0x80] sm:$0xff] }
 0x794   : > { %v2183_v37 = vpop.f32.mrf.mxu3 }
 0x796   : > { %v2212_v39 = vpop.f32.mrf.mxu1 }
 0x797   : > { %v2213_v40 = vadd.f32 %v2212_v39, %v2183_v37 }
 0x799   : > { %v2222_v41 = vadd.f32 %v3094_v38, %v2213_v40 }
 0x79b   : > { %v2931_v42 = vmul.f32 -1.442695, %v2222_v41 }
 0x79c   : > { %v2186_v43 = vpop.f32.mrf.mxu3 }
 0x79d   : > { %3126 = vpow2.f32 %v2931_v42 }
 0x79e   : > { %v2215_v44 = vpop.f32.mrf.mxu1 }
 0x79f   : > { %v2216_v45 = vadd.f32 %v2215_v44, %v2186_v43 }
 0x7a1   : > { %v2223_v46 = vadd.f32 %v3094_v38, %v2216_v45 }
 0x7a3   : > { %v3127_v47 = vpop.eup %3126  ;;  %v2932_v48 = vmul.f32 -1.442695, %v2223_v46 }
 0x7a4   : > { %v2230_v49 = vadd.f32 1.0, %v3127_v47  ;;  %v2531_v47 = vld [vmem:[#allocation18 + $0x178] sm:$0xff] }
 0x7a5   : > { %3128 = vpow2.f32 %v2932_v48  ;;  %v2452_v48 = vld [vmem:[#allocation18 + $0x78] sm:$0xff]  ;;  %2534 = vmatpush.msra.mxu3 %v2531_v47  ;;  %v2518_v47 = vld [vmem:[#allocation18 + $0x110] sm:$0xff] }
 0x7a6   : > { %3130 = vrcp.f32 %v2230_v49  ;;  %v2243_v55 = vand.u32 2147483648, %v2230_v49  ;;  %v2241_v57 = vand.u32 2147483647, %v2230_v49  ;;  %vm2237_vm12 = vweird.f32 %v2230_v49 }
 0x7a8   : > { %v2244_v60 = vor.u32 1.1754944e-38, %v2243_v55  ;;  %vm2242_vm15 = vcmp.eq.f32.partialorder %v2241_v57, 8.507059e+37  ;;  %v2527_v55 = vld [vmem:[#allocation18 + $0x158] sm:$0xff] }
 0x7a9   : > { %v2448_v57 = vld [vmem:[#allocation18 + $0x58] sm:$0xff] }
 0x7ab   : > { %v3129_v50 = vpop.eup %3128 }
 0x7ac   : > { %v3131_v51 = vpop.eup %3130  ;;  %v2231_v52 = vadd.f32 1.0, %v3129_v50  ;;  %v2451_v50 = vld [vmem:[#allocation18 + $0x70] sm:$0xff] }
 0x7ad   : > { %v2233_v53 = vmul.f32 %v3131_v51, %v2230_v49  ;;  %vm2238_vm10 = vweird.f32 %v3131_v51  ;;  %v2530_v49 = vld [vmem:[#allocation18 + $0x170] sm:$0xff] }
 0x7ae   : > { %3132 = vrcp.f32 %v2231_v52  ;;  %vm2239_vm14 = vmor %vm2237_vm12, %vm2238_vm10  ;;  %v2258_v1 = vand.u32 2147483648, %v2231_v52  ;;  %v2256_v3 = vand.u32 2147483647, %v2231_v52  ;;  %vm2252_vm5 = vweird.f32 %v2231_v52  ;;  %2535 = vmatpush.msra.mxu3 %v2530_v49  ;;  %v2558_v49 = vld [vmem:[#allocation18 + $0x190] sm:$0xff] }
 0x7af   : > { %v2234_v54 = vsub.f32 1.0, %v2233_v53  ;;  %v2528_v53 = vld [vmem:[#allocation18 + $0x160] sm:$0xff] }
 0x7b0   : > { %v2259_v5 = vor.u32 1.1754944e-38, %v2258_v1  ;;  %vm2257_vm8 = vcmp.eq.f32.partialorder %v2256_v3, 8.507059e+37  ;;  %v2568_v1 = vld [vmem:[#allocation18 + $0x1e0] sm:$0xff]  ;;  %v2523_v3 = vld [vmem:[#allocation18 + $0x138] sm:$0xff] }
 0x7b1   : > { %v2235_v56 = vmul.f32 %v3131_v51, %v2234_v54  ;;  %v2449_v54 = vld [vmem:[#allocation18 + $0x60] sm:$0xff] }
 0x7b3   : > { %v2236_v58 = vadd.f32 %v3131_v51, %v2235_v56  ;;  %v2571_v56 = vld [vmem:[#allocation18 + $0x1f8] sm:$0xff] }
 0x7b4   : > { %v3133_v59 = vpop.eup %3132 }
 0x7b5   : > { %v2240_v61 = vsel %vm2239_vm14, %v3131_v51, %v2236_v58  ;;  %v2248_v62 = vmul.f32 %v3133_v59, %v2231_v52  ;;  %vm2253_vm0 = vweird.f32 %v3133_v59  ;;  %v2529_v51 = vld [vmem:[#allocation18 + $0x168] sm:$0xff]  ;;  %v2526_v58 = vld [vmem:[#allocation18 + $0x150] sm:$0xff] }
 0x7b6   : > { %v2245_v63 = vsel %vm2242_vm15, %v2244_v60, %v2240_v61  ;;  %vm2254_vm7 = vmor %vm2252_vm5, %vm2253_vm0  ;;  %v2450_v52 = vld [vmem:[#allocation18 + $0x68] sm:$0xff]  ;;  %2536 = vmatpush.msra.mxu3 %v2529_v51  ;;  %v2447_v60 = vld [vmem:[#allocation18 + $0x50] sm:$0xff] }
 0x7b7   : > { %2264 = vperm.xlu2 %3086, %v2245_v63   ;;  %v2249_v0 = vsub.f32 1.0, %v2248_v62  ;;  %v2525_v61 = vld [vmem:[#allocation18 + $0x148] sm:$0xff]  ;;  %v2475_v51 = vld [vmem:[#allocation18 + $0x80] sm:$0xff] }
 0x7b8   : > { %2537 = vmatpush.msra.mxu3 %v2528_v53  ;;  %v2569_v62 = vld [vmem:[#allocation18 + $0x1e8] sm:$0xff]  ;;  %v2437_v53 = vld [vmem:[#allocation18] sm:$0xff] }
 0x7b9   : > { %v2250_v2 = vmul.f32 %v3133_v59, %v2249_v0  ;;  %v2446_v63 = vld [vmem:[#allocation18 + $0x48] sm:$0xff]  ;;  %v2524_v0 = vld [vmem:[#allocation18 + $0x140] sm:$0xff] }
 0x7ba   : > { %2538 = vmatpush.msra.mxu3 %v2527_v55  ;;  %v2516_v55 = vld [vmem:[#allocation18 + $0x100] sm:$0xff] }
 0x7bb   : > { %v2251_v4 = vadd.f32 %v3133_v59, %v2250_v2  ;;  %v2445_v2 = vld [vmem:[#allocation18 + $0x40] sm:$0xff] }
 0x7bc   : > { %2539 = vmatpush.msra.mxu3 %v2526_v58  ;;  %v2612_v58 = vld [vmem:[%s4320_s24 + $0x70] sm:$0xff] }
 0x7bd   : > { %v2255_v21 = vsel %vm2254_vm7, %v3133_v59, %v2251_v4  ;;  %v2570_v59 = vld [vmem:[#allocation18 + $0x1f0] sm:$0xff]  ;;  %v2567_v4 = vld [vmem:[#allocation18 + $0x1d8] sm:$0xff] }
 0x7be   : > { %v2260_v22 = vsel %vm2257_vm8, %v2259_v5, %v2255_v21  ;;  %2540 = vmatpush.msra.mxu3 %v2525_v61  ;;  %v2444_v5 = vld [vmem:[#allocation18 + $0x38] sm:$0xff]  ;;  %v2609_v61 = vld [vmem:[%s4320_s24 + $0x58] sm:$0xff] }
 0x7bf   : > { %2269 = vperm.xlu1 %3085, %v2260_v22  }
 0x7c0   : > { %2541 = vmatpush.msra.mxu3 %v2524_v0  ;;  %v2606_v0 = vld [vmem:[%s4320_s24 + $0x40] sm:$0xff] }
 0x7c2   : > { %2542 = vmatpush.msra.mxu3 %v2523_v3 }
 0x7c4   : > { %2543 = vmatpush.msra.mxu3 %v2522_v26  ;;  %v2602_v26 = vld [vmem:[%s4320_s24 + $0x20] sm:$0xff] }
 0x7c6   : > { %2544 = vmatpush.msra.mxu3 %v2521_v13  ;;  %v2644_v13 = vld [vmem:[%s4322_s26 + $0x30] sm:$0xff] }
 0x7c8   : > { %2545 = vmatpush.msra.mxu3 %v2520_v19  ;;  %v2436_v19 = vld [vmem:[#allocation19] sm:$0x1] }
 0x811   : > { %v2265_v20 = vpop.permute.xlu2 %2264 }
 0x812   : > { %v2272_v25 = vmul.f32 %v2265_v20, %v4105_v12  ;;  %v2937_v12 = vld [vmem:[%s4315_s19 + $0x58] sm:$0xff] }
 0x813   : > { %2339 = vmatpush.msra.mxu0 %v2937_v12  ;;  %v2564_v20 = vld [vmem:[#allocation18 + $0x1c0] sm:$0xff]  ;;  %v2490_v12 = vld [vmem:[#allocation18 + $0xf8] sm:$0xff] }
 0x815   : > { %2340 = vmatpush.msra.mxu0 %v2936_v14  ;;  %v2487_v14 = vld [vmem:[#allocation18 + $0xe0] sm:$0xff] }
 0x817   : > { %2341 = vmatpush.msra.mxu0 %v2935_v33  ;;  %v2484_v33 = vld [vmem:[#allocation18 + $0xc8] sm:$0xff] }
 0x819   : > { %2342 = vmatpush.msra.mxu0 %v2934_v34  ;;  %v2483_v34 = vld [vmem:[#allocation18 + $0xc0] sm:$0xff] }
 0x81b   : > { %2453 = vmatpush.msrb.mxu0 %v2452_v48  ;;  %v2438_v48 = vld [vmem:[#allocation18 + $0x8] sm:$0xff] }
 0x81d   : > { %2454 = vmatpush.msrb.mxu0 %v2451_v50  ;;  %v2476_v50 = vld [vmem:[#allocation18 + $0x88] sm:$0xff] }
 0x81f   : > { %2455 = vmatpush.msrb.mxu0 %v2450_v52  ;;  %v2517_v52 = vld [vmem:[#allocation18 + $0x108] sm:$0xff] }
 0x821   : > { %2456 = vmatpush.msrb.mxu0 %v2449_v54  ;;  %v2557_v54 = vld [vmem:[#allocation18 + $0x188] sm:$0xff] }
 0x823   : > { %2457 = vmatpush.msrb.mxu0 %v2448_v57  ;;  %v2613_v57 = vld [vmem:[%s4320_s24 + $0x78] sm:$0xff] }
 0x825   : > { %2458 = vmatpush.msrb.mxu0 %v2447_v60  ;;  %v2610_v60 = vld [vmem:[%s4320_s24 + $0x60] sm:$0xff] }
 0x827   : > { %2459 = vmatpush.msrb.mxu0 %v2446_v63  ;;  %v2607_v63 = vld [vmem:[%s4320_s24 + $0x48] sm:$0xff] }
 0x829   : > { %2460 = vmatpush.msrb.mxu0 %v2445_v2  ;;  %v2604_v2 = vld [vmem:[%s4320_s24 + $0x30] sm:$0xff] }
 0x82b   : > { %2461 = vmatpush.msrb.mxu0 %v2444_v5 }
 0x82d   : > { %2462 = vmatpush.msrb.mxu0 %v2443_v6  ;;  %v2600_v6 = vld [vmem:[%s4320_s24 + $0x10] sm:$0xff] }
 0x82f   : > { %2463 = vmatpush.msrb.mxu0 %v2442_v17  ;;  %v2642_v17 = vld [vmem:[%s4322_s26 + $0x20] sm:$0xff] }
 0x831   : > { %v2270_v23 = vpop.permute.xlu1 %2269 }
 0x832   : > { %v2273_v24 = vmul.f32 %v2270_v23, %v4102_v11  ;;  %v2948_v11 = vld [vmem:[%s4315_s19 + $0xa0] sm:$0xff]  ;;  %v2441_v23 = vld [vmem:[#allocation18 + $0x20] sm:$0xff] }
 0x833   : > { %2394 = vmatpush.msra.mxu1 %v2948_v11  ;;  %2464 = vmatpush.msrb.mxu0 %v2441_v23 }
 0x834   : > { %2292 = vmatpush.msrb.mxu2 %v2273_v24 }
 0x835   : > { %2395 = vmatpush.msra.mxu1 %v2947_v30  ;;  %v2489_v30 = vld [vmem:[#allocation18 + $0xf0] sm:$0xff] }
 0x836   : > { %2293 = vmatpush.msrb.mxu2 %v2272_v25  ;;  %v2519_v25 = vld [vmem:[#allocation18 + $0x118] sm:$0xff] }
 0x837   : > { %2933 = vmatmul.msk.f32.vlgmr.msrb.gmra.mxu2 %vm2159_vm4, %v2274_v15  ;;  %2396 = vmatpush.msra.mxu1 %v2946_v31  ;;  %v2563_v15 = vld [vmem:[#allocation18 + $0x1b8] sm:$0xff] }
 0x838   : > { %2546 = vmatpush.msra.mxu3 %v2519_v25  ;;  %v2486_v31 = vld [vmem:[#allocation18 + $0xd8] sm:$0xff] }
 0x839   : > { %2397 = vmatpush.msra.mxu1 %v2945_v35  ;;  %v2482_v35 = vld [vmem:[#allocation18 + $0xb8] sm:$0xff] }
 0x83a   : > { %2547 = vmatpush.msra.mxu3 %v2518_v47 }
 0x83b   : > { %2398 = vmatpush.msra.mxu1 %v2944_v36  ;;  %v2481_v36 = vld [vmem:[#allocation18 + $0xb0] sm:$0xff] }
 0x83c   : > { %2548 = vmatpush.msra.mxu3 %v2517_v52 }
 0x83d   : > { %2574 = vmatpush.msrb.mxu1 %v2571_v56  ;;  %v2556_v56 = vld [vmem:[#allocation18 + $0x180] sm:$0xff] }
 0x83e   : > { %2549 = vmatpush.msra.mxu3 %v2516_v55 }
 0x83f   : > { %2575 = vmatpush.msrb.mxu1 %v2570_v59  ;;  %v2611_v59 = vld [vmem:[%s4320_s24 + $0x68] sm:$0xff] }
 0x841   : > { %2576 = vmatpush.msrb.mxu1 %v2569_v62  ;;  %v2608_v62 = vld [vmem:[%s4320_s24 + $0x50] sm:$0xff] }
 0x843   : > { %2577 = vmatpush.msrb.mxu1 %v2568_v1  ;;  %v2605_v1 = vld [vmem:[%s4320_s24 + $0x38] sm:$0xff] }
 0x845   : > { %2578 = vmatpush.msrb.mxu1 %v2567_v4 }
 0x847   : > { %2579 = vmatpush.msrb.mxu1 %v2566_v27  ;;  %v2601_v27 = vld [vmem:[%s4320_s24 + $0x18] sm:$0xff] }
 0x849   : > { %2580 = vmatpush.msrb.mxu1 %v2565_v16  ;;  %v2643_v16 = vld [vmem:[%s4322_s26 + $0x28] sm:$0xff] }
 0x84b   : > { %2581 = vmatpush.msrb.mxu1 %v2564_v20 }
 0x84d   : > { %2582 = vmatpush.msrb.mxu1 %v2563_v15 }
 0x8ba   : > { %v2295_v37 = vpop.f32.mrf.mxu2 }
 0x8bb   : > { %v2299_v38 = vrot.slane %v2295_v37, 7  ;;  %v2480_v37 = vld [vmem:[#allocation18 + $0xa8] sm:$0xff] }
 0x8bd   : > { %v2301_v39 = vsel %vm1441_vm13, 0.0, %v2299_v38  ;;  %v2302_v40 = vsel %vm1441_vm13, %v2299_v38, 0.0  ;;  %v2479_v38 = vld [vmem:[#allocation18 + $0xa0] sm:$0xff]  ;;  %vm2670_vm13 = vcmask 0  }
 0x8be   : > { %v2322_v41 = vrot.slane %v2301_v39, 1  ;;  %v2323_v42 = vrot.slane %v2302_v40, 1  ;;  %v2378_v43 = vrot.slane %v2301_v39, 2  ;;  %v2379_v44 = vrot.slane %v2302_v40, 2  ;;  %2943 = vmatmul.msk.f32.vlgmr.msrb.gmra.mxu3 %vm2006_vm6, %v2301_v39  ;;  %v2478_v39 = vld [vmem:[#allocation18 + $0x98] sm:$0xff]  ;;  %v2477_v40 = vld [vmem:[#allocation18 + $0x90] sm:$0xff] }
 0x8c0   : > { %v2324_v45 = vsel %vm1037_vm2, %v2322_v41, %v2323_v42  ;;  %v2380_v46 = vsel %vm1124_vm3, %v2378_v43, %v2379_v44  ;;  %v2562_v41 = vld [vmem:[#allocation18 + $0x1b0] sm:$0xff]  ;;  %v2561_v42 = vld [vmem:[#allocation18 + $0x1a8] sm:$0xff]  ;;  %v2440_v43 = vld [vmem:[#allocation18 + $0x18] sm:$0xff] }
 0x8c1   : > { %2942 = vmatmul.msk.f32.vlgmr.msra.gmra.mxu0 %vm2006_vm6, %v2324_v45  ;;  %2952 = vmatmul.msk.f32.vlgmr.msra.gmra.mxu1 %vm2006_vm6, %v2380_v46  ;;  %v2560_v44 = vld [vmem:[#allocation18 + $0x1a0] sm:$0xff]  ;;  %v2439_v45 = vld [vmem:[#allocation18 + $0x10] sm:$0xff]  ;;  %v2559_v46 = vld [vmem:[#allocation18 + $0x198] sm:$0xff] }
 0x8c2   : > { %2583 = vmatpush.msrb.mxu1 %v2562_v41  ;;  %2465 = vmatpush.msrb.mxu0 %v2440_v43 }
 0x8c4   : > { %2584 = vmatpush.msrb.mxu1 %v2561_v42  ;;  %2466 = vmatpush.msrb.mxu0 %v2439_v45 }
 0x8c6   : > { %2585 = vmatpush.msrb.mxu1 %v2560_v44  ;;  %2467 = vmatpush.msrb.mxu0 %v2438_v48 }
 0x8c8   : > { %2586 = vmatpush.msrb.mxu1 %v2559_v46  ;;  %2468 = vmatpush.msrb.mxu0 %v2437_v53 }
 0x8ca   : > { %2587 = vmatpush.msrb.mxu1 %v2558_v49  ;;  %2615 = vmatpush.msra.mxu0 %v2613_v57 }
 0x8cc   : > { %2588 = vmatpush.msrb.mxu1 %v2557_v54  ;;  %2616 = vmatpush.msra.mxu0 %v2612_v58 }
 0x8ce   : > { %2589 = vmatpush.msrb.mxu1 %v2556_v56  ;;  %2617 = vmatpush.msra.mxu0 %v2611_v59 }
 0x8d0   : > { %2618 = vmatpush.msra.mxu0 %v2610_v60 }
 0x8d2   : > { %2619 = vmatpush.msra.mxu0 %v2609_v61 }
 0x8d4   : > { %2620 = vmatpush.msra.mxu0 %v2608_v62 }
 0x8d6   : > { %2621 = vmatpush.msra.mxu0 %v2607_v63 }
 0x8d8   : > { %2622 = vmatpush.msra.mxu0 %v2606_v0 }
 0x8da   : > { %2623 = vmatpush.msra.mxu0 %v2605_v1 }
 0x8dc   : > { %2624 = vmatpush.msra.mxu0 %v2604_v2 }
 0x93e   : > { %v2344_v21 = vpop.f32.mrf.mxu0  ;;  %v2400_v9 = vpop.f32.mrf.mxu1 }
 0x941   : > { %v2366_v22 = vpop.f32.mrf.mxu3 }
 0x942   : > { %v2367_v7 = vadd.f32 %v2366_v22, %v2344_v21  ;;  %v2603_v22 = vld [vmem:[%s4320_s24 + $0x28] sm:$0xff] }
 0x943   : > { %2625 = vmatpush.msra.mxu0 %v2603_v22 }
 0x944   : > { %v2403_v18 = vadd.f32 %v2400_v9, %v2367_v7  ;;  %v2599_v7 = vld [vmem:[%s4320_s24 + $0x8] sm:$0xff]  ;;  %v2645_v9 = vld [vmem:[%s4322_s26 + $0x38] sm:$0xff] }
 0x945   : > { %2626 = vmatpush.msra.mxu0 %v2602_v26 }
 0x946   : > { %v2408_v24 = vadd.f32 %v3095_v8, %v2403_v18  ;;  %v2598_v8 = vld [vmem:[%s4320_s24] sm:$0xff]  ;;  %v2641_v18 = vld [vmem:[%s4322_s26 + $0x18] sm:$0xff] }
 0x947   : > { %2627 = vmatpush.msra.mxu0 %v2601_v27 }
 0x948   : > { %v2410_v28 = vmul.f32 0.01, %v2408_v24  ;;  %vm2409_vm2 = vcmp.ge.f32.partialorder %v2408_v24, 0.0 }
 0x949   : > { %2628 = vmatpush.msra.mxu0 %v2600_v6 }
 0x94a   : > { %v2411_v11 = vsel %vm2409_vm2, %v2408_v24, %v2410_v28 }
 0x94b   : > { %2431 = vmatpush.msra.mxu2 %v2411_v11  ;;  %2629 = vmatpush.msra.mxu0 %v2599_v7 }
 0x94c   : > { %2953 = vmatmul.msk.f32.vlgmr.msra.gmra.mxu2 %vm1047_vm1, %v2412_v29 }
 0x94d   : > { %2494 = vmatpush.msrb.mxu2 %v2490_v12  ;;  %2630 = vmatpush.msra.mxu0 %v2598_v8 }
 0x94f   : > { %2495 = vmatpush.msrb.mxu2 %v2489_v30 }
 0x951   : > { %2496 = vmatpush.msrb.mxu2 %v2488_v10  ;;  %v2640_v10 = vld [vmem:[%s4322_s26 + $0x10] sm:$0xff] }
 0x953   : > { %2497 = vmatpush.msrb.mxu2 %v2487_v14  ;;  %v2639_v14 = vld [vmem:[%s4322_s26 + $0x8] sm:$0xff] }
 0x955   : > { %2498 = vmatpush.msrb.mxu2 %v2486_v31  ;;  %v2638_v31 = vld [vmem:[%s4322_s26] sm:$0xff] }
 0x957   : > { %2499 = vmatpush.msrb.mxu2 %v2485_v32  ;;  %v2614_v32 = vld [vmem:[#allocation21] sm:$0x1] }
 0x959   : > { %2500 = vmatpush.msrb.mxu2 %v2484_v33 }
 0x95b   : > { %2501 = vmatpush.msrb.mxu2 %v2483_v34 }
 0x95d   : > { %2502 = vmatpush.msrb.mxu2 %v2482_v35 }
 0x95f   : > { %2503 = vmatpush.msrb.mxu2 %v2481_v36 }
 0x961   : > { %2504 = vmatpush.msrb.mxu2 %v2480_v37  ;;  %v2646_v37 = vld [vmem:[#allocation4] sm:$0x1] }
 0x963   : > { %2505 = vmatpush.msrb.mxu2 %v2479_v38 }
 0x965   : > { %2506 = vmatpush.msrb.mxu2 %v2478_v39 }
 0x967   : > { %2507 = vmatpush.msrb.mxu2 %v2477_v40 }
 0x969   : > { %2508 = vmatpush.msrb.mxu2 %v2476_v50 }
 0x96b   : > { %2509 = vmatpush.msrb.mxu2 %v2475_v51 }
 0x96d   : > { %2658 = vmatpush.msra.mxu2 %v2645_v9 }
 0x96f   : > { %2659 = vmatpush.msra.mxu2 %v2644_v13 }
 0x971   : > { %2660 = vmatpush.msra.mxu2 %v2643_v16 }
 0x973   : > { %2661 = vmatpush.msra.mxu2 %v2642_v17 }
 0x975   : > { %2662 = vmatpush.msra.mxu2 %v2641_v18 }
 0x977   : > { %2663 = vmatpush.msra.mxu2 %v2640_v10 }
 0x979   : > { %2664 = vmatpush.msra.mxu2 %v2639_v14 }
 0x97b   : > { %2665 = vmatpush.msra.mxu2 %v2638_v31 }
 0x9cf   : > { %v2433_v3 = vpop.f32.mrf.mxu2 }
 0x9d0   : > { %v2492_v4 = vrot.slane %v2433_v3, 1  ;;  %v2532_v5 = vrot.slane %v2433_v3, 2  ;;  %v2572_v21 = vrot.slane %v2433_v3, 3  ;;  %2469 = vmatmul.f32.vlgmr.msrb.gmra.mxu0 %v2433_v3 }
 0x9d2   : > { %2510 = vmatmul.f32.vlgmr.msrb.gmra.mxu2 %v2492_v4  ;;  %2550 = vmatmul.f32.vlgmr.msra.gmra.mxu3 %v2532_v5 }
 0x9d3   : > { %2590 = vmatmul.f32.vlgmr.msrb.gmra.mxu1 %v2572_v21 }
 0xa4d   : > { %v2470_v20 = vpop.f32.mrf.mxu0 }
 0xa4e   : > { %v2473_v23 = vadd.f32 %v2470_v20, %v2436_v19 }
 0xa50   : > { %v2591_v29 = vpop.f32.mrf.mxu1 }
 0xa55   : > { %v2511_v24 = vpop.f32.mrf.mxu2  ;;  %v2551_v15 = vpop.f32.mrf.mxu3 }
 0xa56   : > { %v2514_v25 = vadd.f32 %v2511_v24, %v2473_v23 }
 0xa58   : > { %v2554_v28 = vadd.f32 %v2551_v15, %v2514_v25 }
 0xa5a   : > { %v2594_v11 = vadd.f32 %v2591_v29, %v2554_v28 }
 0xa5c   : > { %vm2595_vm1 = vcmp.ge.f32.partialorder %v2594_v11, 0.0  ;;  %v2596_v12 = vmul.f32 0.01, %v2594_v11 }
 0xa5e   : > { %v2597_v30 = vsel %vm2595_vm1, %v2594_v11, %v2596_v12 }
 0xa5f   : > { %2631 = vmatmul.f32.vlgmr.msra.gmra.mxu0 %v2597_v30 }
 0xadc   : > { %v2632_v33 = vpop.f32.mrf.mxu0 }
 0xadd   : > { %v2633_v34 = vadd.f32 %v2632_v33, %v2614_v32 }
 0xadf   : > { %vm2635_vm3 = vcmp.ge.f32.partialorder %v2633_v34, 0.0  ;;  %v2636_v35 = vmul.f32 0.01, %v2633_v34 }
 0xae1   : > { %v2637_v36 = vsel %vm2635_vm3, %v2633_v34, %v2636_v35 }
 0xae2   : > { %2954 = vmatmul.msk.f32.vlgmr.msra.gmra.mxu2 %vm2006_vm6, %v2637_v36 }
 0xb65   : > { %v2667_v38 = vpop.f32.mrf.mxu2 }
 0xb66   : > { %v2668_v39 = vadd.f32 %v2667_v38, %v2646_v37 }
 0xb68   : > { %2671 = vst.msk [vmem:[%s1011_s29] sm:$0x1] %vm2670_vm13, %v2668_v39 }
 0xb69 PF: > { %s4367_s8 = sld [smem:[#allocation28_spill]] }
 0xb6f   : > { %s50_s0 = sadd.s32 1, %s4367_s8  }
 0xb70   : > { %p47_p7 = scmp.ge.s32.totalorder %s50_s0, 4  }
 0xb72   :  { %49 = sbr.rel (!%p47_p7) target bundleno = 30 (0x1e), region = 224 }
 0xb77   :  { %2689 = vsyncpa [#allocation6], 1 }
 0xb78   :  { %2691 = vsyncpa [#allocation6 + $0x1], 1 }
 0xb79   :  { %2692 = vsyncpa [#allocation8], 1 }
 0xb7a   :  { %2693 = vsyncpa [#allocation11], 1 }
 0xb7b   :  { %2694 = vsyncpa [#allocation14], 1 }
 0xb7c   :  { %2695 = vsyncpa [#allocation17], 1 }
 0xb7d   :  { %2696 = vsyncpa [#allocation20], 1 }

</bundles_post_ra>
